<compile_context>
chip_gen: v7x
topology: tpu7x:2x2x1
jax: 0.10.0
libtpu: 0.0.40
codegen_flags: <defaults>
</compile_context>

<pallas_src>
import jax
import jax.numpy as jnp
from jax import lax
from jax.experimental import pallas as pl
from jax.experimental.pallas import tpu as pltpu


# ----------------------------- Pallas kernel --------------------------------
def _lstm_ln_fc_kernel(xf_ref, t_ref,
                       wih0_ref, whh0_ref, b0_ref,
                       wih1_ref, whh1_ref, b1_ref,
                       gamma_ref, beta_ref,
                       fcw_h_ref, fcw_t_ref, fcb_ref,
                       out_ref):
    TB, _ = xf_ref.shape
    B = t_ref.shape[0]
    T = TB // B
    H = whh0_ref.shape[0]          # whh is pre-transposed: (H, 4H)

    # Hoist weight/bias loads out of the unrolled recurrence.
    whh0 = whh0_ref[...]
    wih1 = wih1_ref[...]
    whh1 = whh1_ref[...]
    b1 = b1_ref[...]

    def activate(gates, c):
        # Gate columns were re-ordered in the wrapper to [i, f, o, g] so a
        # single sigmoid covers the first 3H lanes and a single tanh the rest.
        sig = jax.nn.sigmoid(gates[:, :3 * H])
        g_g = jnp.tanh(gates[:, 3 * H:])
        i_g = sig[:, 0 * H:1 * H]
        f_g = sig[:, 1 * H:2 * H]
        o_g = sig[:, 2 * H:3 * H]
        c_new = f_g * c + i_g * g_g
        h_new = o_g * jnp.tanh(c_new)
        return h_new, c_new

    zeros = jnp.zeros((B, H), jnp.float32)   # h_0 / c_0 are zeros, as in forward()

    # ---- Hoisted layer-0 input projection (one batched MXU matmul, off the
    #      recurrent critical path).
    xg0 = (jnp.dot(xf_ref[...], wih0_ref[...], preferred_element_type=jnp.float32)
           + b0_ref[...])                                   # (T*B, 4H)

    # TODO(synk): nn.LSTM inter-layer dropout (p=0.2) is training-only; it is an
    # identity at inference, so it is omitted here.

    # ---- Wavefront recurrence, fully unrolled (T is a small compile-time
    #      constant).  Layer-1 step t depends only on (h0_t, h1_{t-1}); layer-0
    #      step t+1 depends only on h0_t, so the scheduler overlaps them.
    h0, c0 = zeros, zeros
    h1, c1 = zeros, zeros
    for ts in range(T):
        # layer 0 cell: only the hidden-state matmul is on the serial chain.
        g0 = (xg0[ts * B:(ts + 1) * B, :]
              + jnp.dot(h0, whh0, preferred_element_type=jnp.float32))
        h0, c0 = activate(g0, c0)

        # layer 1 cell: input projection of h0_t + hidden-state matmul.
        g1 = (jnp.dot(h0, wih1, preferred_element_type=jnp.float32)
              + jnp.dot(h1, whh1, preferred_element_type=jnp.float32)
              + b1)
        h1, c1 = activate(g1, c1)

    # ---- LayerNorm over hidden_dim on the last timestep of the top layer.
    mean = jnp.mean(h1, axis=-1, keepdims=True)
    var = jnp.mean((h1 - mean) ** 2, axis=-1, keepdims=True)
    ln = (h1 - mean) * lax.rsqrt(var + 1e-5) * gamma_ref[...] + beta_ref[...]

    # ---- FC head:  fc([ln, t]) == ln @ W_h + t @ W_t + b.
    y = jnp.dot(ln, fcw_h_ref[...], preferred_element_type=jnp.float32)
    y = y + t_ref[:, 0:1] * fcw_t_ref[0:1, :] + t_ref[:, 1:2] * fcw_t_ref[1:2, :]
    out_ref[...] = y + fcb_ref[...]


# ------------------------------- Wrapper -------------------------------------
def _reorder_gates_T(w, H):
    """PyTorch LSTM weight (4H, K), gate rows [i, f, g, o] -> transposed (K, 4H)
    with gate column order [i, f, o, g]."""
    w_r = jnp.concatenate([w[0:H], w[H:2 * H], w[3 * H:4 * H], w[2 * H:3 * H]], axis=0)
    return jnp.transpose(w_r)


def _reorder_gates_b(b, H):
    return jnp.concatenate(
        [b[0:H], b[H:2 * H], b[3 * H:4 * H], b[2 * H:3 * H]]).reshape(1, 4 * H)


def layer_norm_lstm_forward(x, t, params):
    """x: (B, T, input_dim) batch_first, t: (B, 2). Returns (B, output_dim)."""
    B, T, D = x.shape
    H = params["whh0"].shape[1]
    out_dim = params["fcb"].shape[0]

    # Time-major flat (T*B, D): the hoisted layer-0 input projection becomes
    # one batched matmul and per-step slices inside the kernel are static.
    x_flat = jnp.transpose(x, (1, 0, 2)).reshape(T * B, D).astype(jnp.float32)

    args = (
        x_flat,
        t.astype(jnp.float32),
        _reorder_gates_T(params["wih0"], H),   # (D, 4H)
        _reorder_gates_T(params["whh0"], H),   # (H, 4H)
        _reorder_gates_b(params["b0"], H),     # (1, 4H) == b_ih + b_hh
        _reorder_gates_T(params["wih1"], H),   # (H, 4H)
        _reorder_gates_T(params["whh1"], H),   # (H, 4H)
        _reorder_gates_b(params["b1"], H),     # (1, 4H)
        params["gamma"].reshape(1, H),
        params["beta"].reshape(1, H),
        jnp.transpose(params["fcw"][:, :H]),   # (H, out)
        jnp.transpose(params["fcw"][:, H:]),   # (2, out)
        params["fcb"].reshape(1, out_dim),
    )
    vmem_spec = pl.BlockSpec(memory_space=pltpu.MemorySpace.VMEM)
    return pl.pallas_call(
        _lstm_ln_fc_kernel,
        out_shape=jax.ShapeDtypeStruct((B, out_dim), jnp.float32),
        in_specs=[vmem_spec] * len(args),
        out_specs=vmem_spec,
    )(*args)


# --------------------------- Pure-JAX reference ------------------------------
def reference_forward(x, t, p):
    B, T, _ = x.shape
    H = p["whh0"].shape[1]
    h0 = c0 = h1 = c1 = jnp.zeros((B, H), jnp.float32)

    def cell(xt, h, c, wih, whh, b):
        g = xt @ wih.T + h @ whh.T + b
        i, f, gg, o = jnp.split(g, 4, axis=-1)
        c = jax.nn.sigmoid(f) * c + jax.nn.sigmoid(i) * jnp.tanh(gg)
        h = jax.nn.sigmoid(o) * jnp.tanh(c)
        return h, c

    for ts in range(T):
        xt = x[:, ts, :]
        h0, c0 = cell(xt, h0, c0, p["wih0"], p["whh0"], p["b0"])
        h1, c1 = cell(h0, h1, c1, p["wih1"], p["whh1"], p["b1"])

    mean = h1.mean(-1, keepdims=True)
    var = ((h1 - mean) ** 2).mean(-1, keepdims=True)
    ln = (h1 - mean) / jnp.sqrt(var + 1e-5) * p["gamma"] + p["beta"]
    comb = jnp.concatenate([ln, t], axis=-1)
    return comb @ p["fcw"].T + p["fcb"]


# ---------------------------- Param construction -----------------------------
def make_params(key, input_dim, hidden_dim, output_dim):
    H = hidden_dim
    k = jax.random.split(key, 12)
    s_lstm = 1.0 / jnp.sqrt(H)
    s_fc = 1.0 / jnp.sqrt(H + 2)

    def u(kk, shape, s):
        return jax.random.uniform(kk, shape, jnp.float32, -s, s)

    return {
        # layer 0
        "wih0": u(k[0], (4 * H, input_dim), s_lstm),
        "whh0": u(k[1], (4 * H, H), s_lstm),
        "b0":   u(k[2], (4 * H,), s_lstm) + u(k[3], (4 * H,), s_lstm),  # b_ih + b_hh
        # layer 1
        "wih1": u(k[4], (4 * H, H), s_lstm),
        "whh1": u(k[5], (4 * H, H), s_lstm),
        "b1":   u(k[6], (4 * H,), s_lstm) + u(k[7], (4 * H,), s_lstm),
        # LayerNorm
        "gamma": jnp.ones((H,), jnp.float32),
        "beta":  jnp.zeros((H,), jnp.float32),
        # fc: Linear(hidden_dim + 2, output_dim)
        "fcw": u(k[8], (output_dim, H + 2), s_fc),
        "fcb": u(k[9], (output_dim,), s_fc),
    }


# ---------------------------------- Main -------------------------------------
if __name__ == "__main__":
    B, T = 2, 8
    input_dim, hidden_dim, output_dim = 4, 32, 3

    key = jax.random.PRNGKey(0)
    kx, kt, kp = jax.random.split(key, 3)
    x = jax.random.normal(kx, (B, T, input_dim), jnp.float32)
    t = jax.random.normal(kt, (B, 2), jnp.float32)
    params = make_params(kp, input_dim, hidden_dim, output_dim)

    out = layer_norm_lstm_forward(x, t, params)
    out = jax.block_until_ready(out)

    ref = reference_forward(x, t, params)
    assert out.shape == (B, output_dim)
    assert jnp.allclose(out, ref, atol=1e-4, rtol=1e-4), (out, ref)

    print("KERNEL_OK")
</pallas_src>

<mosaic_0001>
module attributes {stable_mosaic.version = 11 : i64} {
  func.func @_lstm_ln_fc_kernel(%arg0: memref<16x4xf32, #tpu.memory_space<vmem>>, %arg1: memref<2x2xf32, #tpu.memory_space<vmem>>, %arg2: memref<4x128xf32, #tpu.memory_space<vmem>>, %arg3: memref<32x128xf32, #tpu.memory_space<vmem>>, %arg4: memref<1x128xf32, #tpu.memory_space<vmem>>, %arg5: memref<32x128xf32, #tpu.memory_space<vmem>>, %arg6: memref<32x128xf32, #tpu.memory_space<vmem>>, %arg7: memref<1x128xf32, #tpu.memory_space<vmem>>, %arg8: memref<1x32xf32, #tpu.memory_space<vmem>>, %arg9: memref<1x32xf32, #tpu.memory_space<vmem>>, %arg10: memref<32x3xf32, #tpu.memory_space<vmem>>, %arg11: memref<2x3xf32, #tpu.memory_space<vmem>>, %arg12: memref<1x3xf32, #tpu.memory_space<vmem>>, %arg13: memref<2x3xf32, #tpu.memory_space<vmem>>) attributes {dimension_semantics = [], scalar_prefetch = 0 : i64, scratch_operands = 0 : i64, tpu.core_type = #tpu.core_type<tc>} {
    %c0 = arith.constant 0 : index
    %c0_0 = arith.constant 0 : index
    %0 = vector.load %arg3[%c0, %c0_0] : memref<32x128xf32, #tpu.memory_space<vmem>>, vector<32x128xf32>
    %c0_1 = arith.constant 0 : index
    %c0_2 = arith.constant 0 : index
    %1 = vector.load %arg5[%c0_1, %c0_2] : memref<32x128xf32, #tpu.memory_space<vmem>>, vector<32x128xf32>
    %c0_3 = arith.constant 0 : index
    %c0_4 = arith.constant 0 : index
    %2 = vector.load %arg6[%c0_3, %c0_4] : memref<32x128xf32, #tpu.memory_space<vmem>>, vector<32x128xf32>
    %c0_5 = arith.constant 0 : index
    %c0_6 = arith.constant 0 : index
    %3 = vector.load %arg7[%c0_5, %c0_6] : memref<1x128xf32, #tpu.memory_space<vmem>>, vector<1x128xf32>
    %cst = arith.constant 0.000000e+00 : f32
    %4 = vector.broadcast %cst : f32 to vector<2x32xf32>
    %c0_7 = arith.constant 0 : index
    %c0_8 = arith.constant 0 : index
    %5 = vector.load %arg0[%c0_7, %c0_8] : memref<16x4xf32, #tpu.memory_space<vmem>>, vector<16x4xf32>
    %c0_9 = arith.constant 0 : index
    %c0_10 = arith.constant 0 : index
    %6 = vector.load %arg2[%c0_9, %c0_10] : memref<4x128xf32, #tpu.memory_space<vmem>>, vector<4x128xf32>
    %cst_11 = arith.constant dense<0.000000e+00> : vector<16x128xf32>
    %7 = tpu.matmul %5, %6, %cst_11 {dimension_numbers = #tpu.dot_dimension_numbers<[1], [0], [0], [1], [0, 0, 1, 1], [], []>} : vector<16x4xf32>, vector<4x128xf32>, vector<16x128xf32> -> vector<16x128xf32>
    %c0_12 = arith.constant 0 : index
    %c0_13 = arith.constant 0 : index
    %8 = vector.load %arg4[%c0_12, %c0_13] : memref<1x128xf32, #tpu.memory_space<vmem>>, vector<1x128xf32>
    %9 = vector.broadcast %8 : vector<1x128xf32> to vector<16x128xf32>
    %10 = arith.addf %7, %9 : vector<16x128xf32>
    %11 = vector.extract_strided_slice %10 {offsets = [0, 0], sizes = [2, 128], strides = [1, 1]} : vector<16x128xf32> to vector<2x128xf32>
    %cst_14 = arith.constant dense<0.000000e+00> : vector<2x128xf32>
    %12 = tpu.matmul %4, %0, %cst_14 {dimension_numbers = #tpu.dot_dimension_numbers<[1], [0], [0], [1], [0, 0, 1, 1], [], []>} : vector<2x32xf32>, vector<32x128xf32>, vector<2x128xf32> -> vector<2x128xf32>
    %13 = arith.addf %11, %12 : vector<2x128xf32>
    %14 = vector.extract_strided_slice %13 {offsets = [0, 0], sizes = [2, 96], strides = [1, 1]} : vector<2x128xf32> to vector<2x96xf32>
    %15 = arith.negf %14 : vector<2x96xf32>
    %16 = math.exp %15 : vector<2x96xf32>
    %cst_15 = arith.constant 1.000000e+00 : f32
    %17 = vector.broadcast %cst_15 : f32 to vector<2x96xf32>
    %18 = arith.addf %17, %16 : vector<2x96xf32>
    %19 = arith.divf %17, %18 : vector<2x96xf32>
    %20 = vector.extract_strided_slice %13 {offsets = [0, 96], sizes = [2, 32], strides = [1, 1]} : vector<2x128xf32> to vector<2x32xf32>
    %21 = math.tanh %20 : vector<2x32xf32>
    %22 = vector.extract_strided_slice %19 {offsets = [0, 0], sizes = [2, 32], strides = [1, 1]} : vector<2x96xf32> to vector<2x32xf32>
    %23 = vector.extract_strided_slice %19 {offsets = [0, 32], sizes = [2, 32], strides = [1, 1]} : vector<2x96xf32> to vector<2x32xf32>
    %24 = vector.extract_strided_slice %19 {offsets = [0, 64], sizes = [2, 32], strides = [1, 1]} : vector<2x96xf32> to vector<2x32xf32>
    %25 = arith.mulf %23, %4 : vector<2x32xf32>
    %26 = arith.mulf %22, %21 : vector<2x32xf32>
    %27 = arith.addf %25, %26 : vector<2x32xf32>
    %28 = math.tanh %27 : vector<2x32xf32>
    %29 = arith.mulf %24, %28 : vector<2x32xf32>
    %cst_16 = arith.constant dense<0.000000e+00> : vector<2x128xf32>
    %30 = tpu.matmul %29, %1, %cst_16 {dimension_numbers = #tpu.dot_dimension_numbers<[1], [0], [0], [1], [0, 0, 1, 1], [], []>} : vector<2x32xf32>, vector<32x128xf32>, vector<2x128xf32> -> vector<2x128xf32>
    %cst_17 = arith.constant dense<0.000000e+00> : vector<2x128xf32>
    %31 = tpu.matmul %4, %2, %cst_17 {dimension_numbers = #tpu.dot_dimension_numbers<[1], [0], [0], [1], [0, 0, 1, 1], [], []>} : vector<2x32xf32>, vector<32x128xf32>, vector<2x128xf32> -> vector<2x128xf32>
    %32 = arith.addf %30, %31 : vector<2x128xf32>
    %33 = vector.broadcast %3 : vector<1x128xf32> to vector<2x128xf32>
    %34 = arith.addf %32, %33 : vector<2x128xf32>
    %35 = vector.extract_strided_slice %34 {offsets = [0, 0], sizes = [2, 96], strides = [1, 1]} : vector<2x128xf32> to vector<2x96xf32>
    %36 = arith.negf %35 : vector<2x96xf32>
    %37 = math.exp %36 : vector<2x96xf32>
    %cst_18 = arith.constant 1.000000e+00 : f32
    %38 = vector.broadcast %cst_18 : f32 to vector<2x96xf32>
    %39 = arith.addf %38, %37 : vector<2x96xf32>
    %40 = arith.divf %38, %39 : vector<2x96xf32>
    %41 = vector.extract_strided_slice %34 {offsets = [0, 96], sizes = [2, 32], strides = [1, 1]} : vector<2x128xf32> to vector<2x32xf32>
    %42 = math.tanh %41 : vector<2x32xf32>
    %43 = vector.extract_strided_slice %40 {offsets = [0, 0], sizes = [2, 32], strides = [1, 1]} : vector<2x96xf32> to vector<2x32xf32>
    %44 = vector.extract_strided_slice %40 {offsets = [0, 32], sizes = [2, 32], strides = [1, 1]} : vector<2x96xf32> to vector<2x32xf32>
    %45 = vector.extract_strided_slice %40 {offsets = [0, 64], sizes = [2, 32], strides = [1, 1]} : vector<2x96xf32> to vector<2x32xf32>
    %46 = arith.mulf %44, %4 : vector<2x32xf32>
    %47 = arith.mulf %43, %42 : vector<2x32xf32>
    %48 = arith.addf %46, %47 : vector<2x32xf32>
    %49 = math.tanh %48 : vector<2x32xf32>
    %50 = arith.mulf %45, %49 : vector<2x32xf32>
    %51 = vector.extract_strided_slice %10 {offsets = [2, 0], sizes = [2, 128], strides = [1, 1]} : vector<16x128xf32> to vector<2x128xf32>
    %cst_19 = arith.constant dense<0.000000e+00> : vector<2x128xf32>
    %52 = tpu.matmul %29, %0, %cst_19 {dimension_numbers = #tpu.dot_dimension_numbers<[1], [0], [0], [1], [0, 0, 1, 1], [], []>} : vector<2x32xf32>, vector<32x128xf32>, vector<2x128xf32> -> vector<2x128xf32>
    %53 = arith.addf %51, %52 : vector<2x128xf32>
    %54 = vector.extract_strided_slice %53 {offsets = [0, 0], sizes = [2, 96], strides = [1, 1]} : vector<2x128xf32> to vector<2x96xf32>
    %55 = arith.negf %54 : vector<2x96xf32>
    %56 = math.exp %55 : vector<2x96xf32>
    %cst_20 = arith.constant 1.000000e+00 : f32
    %57 = vector.broadcast %cst_20 : f32 to vector<2x96xf32>
    %58 = arith.addf %57, %56 : vector<2x96xf32>
    %59 = arith.divf %57, %58 : vector<2x96xf32>
    %60 = vector.extract_strided_slice %53 {offsets = [0, 96], sizes = [2, 32], strides = [1, 1]} : vector<2x128xf32> to vector<2x32xf32>
    %61 = math.tanh %60 : vector<2x32xf32>
    %62 = vector.extract_strided_slice %59 {offsets = [0, 0], sizes = [2, 32], strides = [1, 1]} : vector<2x96xf32> to vector<2x32xf32>
    %63 = vector.extract_strided_slice %59 {offsets = [0, 32], sizes = [2, 32], strides = [1, 1]} : vector<2x96xf32> to vector<2x32xf32>
    %64 = vector.extract_strided_slice %59 {offsets = [0, 64], sizes = [2, 32], strides = [1, 1]} : vector<2x96xf32> to vector<2x32xf32>
    %65 = arith.mulf %63, %27 : vector<2x32xf32>
    %66 = arith.mulf %62, %61 : vector<2x32xf32>
    %67 = arith.addf %65, %66 : vector<2x32xf32>
    %68 = math.tanh %67 : vector<2x32xf32>
    %69 = arith.mulf %64, %68 : vector<2x32xf32>
    %cst_21 = arith.constant dense<0.000000e+00> : vector<2x128xf32>
    %70 = tpu.matmul %69, %1, %cst_21 {dimension_numbers = #tpu.dot_dimension_numbers<[1], [0], [0], [1], [0, 0, 1, 1], [], []>} : vector<2x32xf32>, vector<32x128xf32>, vector<2x128xf32> -> vector<2x128xf32>
    %cst_22 = arith.constant dense<0.000000e+00> : vector<2x128xf32>
    %71 = tpu.matmul %50, %2, %cst_22 {dimension_numbers = #tpu.dot_dimension_numbers<[1], [0], [0], [1], [0, 0, 1, 1], [], []>} : vector<2x32xf32>, vector<32x128xf32>, vector<2x128xf32> -> vector<2x128xf32>
    %72 = arith.addf %70, %71 : vector<2x128xf32>
    %73 = vector.broadcast %3 : vector<1x128xf32> to vector<2x128xf32>
    %74 = arith.addf %72, %73 : vector<2x128xf32>
    %75 = vector.extract_strided_slice %74 {offsets = [0, 0], sizes = [2, 96], strides = [1, 1]} : vector<2x128xf32> to vector<2x96xf32>
    %76 = arith.negf %75 : vector<2x96xf32>
    %77 = math.exp %76 : vector<2x96xf32>
    %cst_23 = arith.constant 1.000000e+00 : f32
    %78 = vector.broadcast %cst_23 : f32 to vector<2x96xf32>
    %79 = arith.addf %78, %77 : vector<2x96xf32>
    %80 = arith.divf %78, %79 : vector<2x96xf32>
    %81 = vector.extract_strided_slice %74 {offsets = [0, 96], sizes = [2, 32], strides = [1, 1]} : vector<2x128xf32> to vector<2x32xf32>
    %82 = math.tanh %81 : vector<2x32xf32>
    %83 = vector.extract_strided_slice %80 {offsets = [0, 0], sizes = [2, 32], strides = [1, 1]} : vector<2x96xf32> to vector<2x32xf32>
    %84 = vector.extract_strided_slice %80 {offsets = [0, 32], sizes = [2, 32], strides = [1, 1]} : vector<2x96xf32> to vector<2x32xf32>
    %85 = vector.extract_strided_slice %80 {offsets = [0, 64], sizes = [2, 32], strides = [1, 1]} : vector<2x96xf32> to vector<2x32xf32>
    %86 = arith.mulf %84, %48 : vector<2x32xf32>
    %87 = arith.mulf %83, %82 : vector<2x32xf32>
    %88 = arith.addf %86, %87 : vector<2x32xf32>
    %89 = math.tanh %88 : vector<2x32xf32>
    %90 = arith.mulf %85, %89 : vector<2x32xf32>
    %91 = vector.extract_strided_slice %10 {offsets = [4, 0], sizes = [2, 128], strides = [1, 1]} : vector<16x128xf32> to vector<2x128xf32>
    %cst_24 = arith.constant dense<0.000000e+00> : vector<2x128xf32>
    %92 = tpu.matmul %69, %0, %cst_24 {dimension_numbers = #tpu.dot_dimension_numbers<[1], [0], [0], [1], [0, 0, 1, 1], [], []>} : vector<2x32xf32>, vector<32x128xf32>, vector<2x128xf32> -> vector<2x128xf32>
    %93 = arith.addf %91, %92 : vector<2x128xf32>
    %94 = vector.extract_strided_slice %93 {offsets = [0, 0], sizes = [2, 96], strides = [1, 1]} : vector<2x128xf32> to vector<2x96xf32>
    %95 = arith.negf %94 : vector<2x96xf32>
    %96 = math.exp %95 : vector<2x96xf32>
    %cst_25 = arith.constant 1.000000e+00 : f32
    %97 = vector.broadcast %cst_25 : f32 to vector<2x96xf32>
    %98 = arith.addf %97, %96 : vector<2x96xf32>
    %99 = arith.divf %97, %98 : vector<2x96xf32>
    %100 = vector.extract_strided_slice %93 {offsets = [0, 96], sizes = [2, 32], strides = [1, 1]} : vector<2x128xf32> to vector<2x32xf32>
    %101 = math.tanh %100 : vector<2x32xf32>
    %102 = vector.extract_strided_slice %99 {offsets = [0, 0], sizes = [2, 32], strides = [1, 1]} : vector<2x96xf32> to vector<2x32xf32>
    %103 = vector.extract_strided_slice %99 {offsets = [0, 32], sizes = [2, 32], strides = [1, 1]} : vector<2x96xf32> to vector<2x32xf32>
    %104 = vector.extract_strided_slice %99 {offsets = [0, 64], sizes = [2, 32], strides = [1, 1]} : vector<2x96xf32> to vector<2x32xf32>
    %105 = arith.mulf %103, %67 : vector<2x32xf32>
    %106 = arith.mulf %102, %101 : vector<2x32xf32>
    %107 = arith.addf %105, %106 : vector<2x32xf32>
    %108 = math.tanh %107 : vector<2x32xf32>
    %109 = arith.mulf %104, %108 : vector<2x32xf32>
    %cst_26 = arith.constant dense<0.000000e+00> : vector<2x128xf32>
    %110 = tpu.matmul %109, %1, %cst_26 {dimension_numbers = #tpu.dot_dimension_numbers<[1], [0], [0], [1], [0, 0, 1, 1], [], []>} : vector<2x32xf32>, vector<32x128xf32>, vector<2x128xf32> -> vector<2x128xf32>
    %cst_27 = arith.constant dense<0.000000e+00> : vector<2x128xf32>
    %111 = tpu.matmul %90, %2, %cst_27 {dimension_numbers = #tpu.dot_dimension_numbers<[1], [0], [0], [1], [0, 0, 1, 1], [], []>} : vector<2x32xf32>, vector<32x128xf32>, vector<2x128xf32> -> vector<2x128xf32>
    %112 = arith.addf %110, %111 : vector<2x128xf32>
    %113 = vector.broadcast %3 : vector<1x128xf32> to vector<2x128xf32>
    %114 = arith.addf %112, %113 : vector<2x128xf32>
    %115 = vector.extract_strided_slice %114 {offsets = [0, 0], sizes = [2, 96], strides = [1, 1]} : vector<2x128xf32> to vector<2x96xf32>
    %116 = arith.negf %115 : vector<2x96xf32>
    %117 = math.exp %116 : vector<2x96xf32>
    %cst_28 = arith.constant 1.000000e+00 : f32
    %118 = vector.broadcast %cst_28 : f32 to vector<2x96xf32>
    %119 = arith.addf %118, %117 : vector<2x96xf32>
    %120 = arith.divf %118, %119 : vector<2x96xf32>
    %121 = vector.extract_strided_slice %114 {offsets = [0, 96], sizes = [2, 32], strides = [1, 1]} : vector<2x128xf32> to vector<2x32xf32>
    %122 = math.tanh %121 : vector<2x32xf32>
    %123 = vector.extract_strided_slice %120 {offsets = [0, 0], sizes = [2, 32], strides = [1, 1]} : vector<2x96xf32> to vector<2x32xf32>
    %124 = vector.extract_strided_slice %120 {offsets = [0, 32], sizes = [2, 32], strides = [1, 1]} : vector<2x96xf32> to vector<2x32xf32>
    %125 = vector.extract_strided_slice %120 {offsets = [0, 64], sizes = [2, 32], strides = [1, 1]} : vector<2x96xf32> to vector<2x32xf32>
    %126 = arith.mulf %124, %88 : vector<2x32xf32>
    %127 = arith.mulf %123, %122 : vector<2x32xf32>
    %128 = arith.addf %126, %127 : vector<2x32xf32>
    %129 = math.tanh %128 : vector<2x32xf32>
    %130 = arith.mulf %125, %129 : vector<2x32xf32>
    %131 = vector.extract_strided_slice %10 {offsets = [6, 0], sizes = [2, 128], strides = [1, 1]} : vector<16x128xf32> to vector<2x128xf32>
    %cst_29 = arith.constant dense<0.000000e+00> : vector<2x128xf32>
    %132 = tpu.matmul %109, %0, %cst_29 {dimension_numbers = #tpu.dot_dimension_numbers<[1], [0], [0], [1], [0, 0, 1, 1], [], []>} : vector<2x32xf32>, vector<32x128xf32>, vector<2x128xf32> -> vector<2x128xf32>
    %133 = arith.addf %131, %132 : vector<2x128xf32>
    %134 = vector.extract_strided_slice %133 {offsets = [0, 0], sizes = [2, 96], strides = [1, 1]} : vector<2x128xf32> to vector<2x96xf32>
    %135 = arith.negf %134 : vector<2x96xf32>
    %136 = math.exp %135 : vector<2x96xf32>
    %cst_30 = arith.constant 1.000000e+00 : f32
    %137 = vector.broadcast %cst_30 : f32 to vector<2x96xf32>
    %138 = arith.addf %137, %136 : vector<2x96xf32>
    %139 = arith.divf %137, %138 : vector<2x96xf32>
    %140 = vector.extract_strided_slice %133 {offsets = [0, 96], sizes = [2, 32], strides = [1, 1]} : vector<2x128xf32> to vector<2x32xf32>
    %141 = math.tanh %140 : vector<2x32xf32>
    %142 = vector.extract_strided_slice %139 {offsets = [0, 0], sizes = [2, 32], strides = [1, 1]} : vector<2x96xf32> to vector<2x32xf32>
    %143 = vector.extract_strided_slice %139 {offsets = [0, 32], sizes = [2, 32], strides = [1, 1]} : vector<2x96xf32> to vector<2x32xf32>
    %144 = vector.extract_strided_slice %139 {offsets = [0, 64], sizes = [2, 32], strides = [1, 1]} : vector<2x96xf32> to vector<2x32xf32>
    %145 = arith.mulf %143, %107 : vector<2x32xf32>
    %146 = arith.mulf %142, %141 : vector<2x32xf32>
    %147 = arith.addf %145, %146 : vector<2x32xf32>
    %148 = math.tanh %147 : vector<2x32xf32>
    %149 = arith.mulf %144, %148 : vector<2x32xf32>
    %cst_31 = arith.constant dense<0.000000e+00> : vector<2x128xf32>
    %150 = tpu.matmul %149, %1, %cst_31 {dimension_numbers = #tpu.dot_dimension_numbers<[1], [0], [0], [1], [0, 0, 1, 1], [], []>} : vector<2x32xf32>, vector<32x128xf32>, vector<2x128xf32> -> vector<2x128xf32>
    %cst_32 = arith.constant dense<0.000000e+00> : vector<2x128xf32>
    %151 = tpu.matmul %130, %2, %cst_32 {dimension_numbers = #tpu.dot_dimension_numbers<[1], [0], [0], [1], [0, 0, 1, 1], [], []>} : vector<2x32xf32>, vector<32x128xf32>, vector<2x128xf32> -> vector<2x128xf32>
    %152 = arith.addf %150, %151 : vector<2x128xf32>
    %153 = vector.broadcast %3 : vector<1x128xf32> to vector<2x128xf32>
    %154 = arith.addf %152, %153 : vector<2x128xf32>
    %155 = vector.extract_strided_slice %154 {offsets = [0, 0], sizes = [2, 96], strides = [1, 1]} : vector<2x128xf32> to vector<2x96xf32>
    %156 = arith.negf %155 : vector<2x96xf32>
    %157 = math.exp %156 : vector<2x96xf32>
    %cst_33 = arith.constant 1.000000e+00 : f32
    %158 = vector.broadcast %cst_33 : f32 to vector<2x96xf32>
    %159 = arith.addf %158, %157 : vector<2x96xf32>
    %160 = arith.divf %158, %159 : vector<2x96xf32>
    %161 = vector.extract_strided_slice %154 {offsets = [0, 96], sizes = [2, 32], strides = [1, 1]} : vector<2x128xf32> to vector<2x32xf32>
    %162 = math.tanh %161 : vector<2x32xf32>
    %163 = vector.extract_strided_slice %160 {offsets = [0, 0], sizes = [2, 32], strides = [1, 1]} : vector<2x96xf32> to vector<2x32xf32>
    %164 = vector.extract_strided_slice %160 {offsets = [0, 32], sizes = [2, 32], strides = [1, 1]} : vector<2x96xf32> to vector<2x32xf32>
    %165 = vector.extract_strided_slice %160 {offsets = [0, 64], sizes = [2, 32], strides = [1, 1]} : vector<2x96xf32> to vector<2x32xf32>
    %166 = arith.mulf %164, %128 : vector<2x32xf32>
    %167 = arith.mulf %163, %162 : vector<2x32xf32>
    %168 = arith.addf %166, %167 : vector<2x32xf32>
    %169 = math.tanh %168 : vector<2x32xf32>
    %170 = arith.mulf %165, %169 : vector<2x32xf32>
    %171 = vector.extract_strided_slice %10 {offsets = [8, 0], sizes = [2, 128], strides = [1, 1]} : vector<16x128xf32> to vector<2x128xf32>
    %cst_34 = arith.constant dense<0.000000e+00> : vector<2x128xf32>
    %172 = tpu.matmul %149, %0, %cst_34 {dimension_numbers = #tpu.dot_dimension_numbers<[1], [0], [0], [1], [0, 0, 1, 1], [], []>} : vector<2x32xf32>, vector<32x128xf32>, vector<2x128xf32> -> vector<2x128xf32>
    %173 = arith.addf %171, %172 : vector<2x128xf32>
    %174 = vector.extract_strided_slice %173 {offsets = [0, 0], sizes = [2, 96], strides = [1, 1]} : vector<2x128xf32> to vector<2x96xf32>
    %175 = arith.negf %174 : vector<2x96xf32>
    %176 = math.exp %175 : vector<2x96xf32>
    %cst_35 = arith.constant 1.000000e+00 : f32
    %177 = vector.broadcast %cst_35 : f32 to vector<2x96xf32>
    %178 = arith.addf %177, %176 : vector<2x96xf32>
    %179 = arith.divf %177, %178 : vector<2x96xf32>
    %180 = vector.extract_strided_slice %173 {offsets = [0, 96], sizes = [2, 32], strides = [1, 1]} : vector<2x128xf32> to vector<2x32xf32>
    %181 = math.tanh %180 : vector<2x32xf32>
    %182 = vector.extract_strided_slice %179 {offsets = [0, 0], sizes = [2, 32], strides = [1, 1]} : vector<2x96xf32> to vector<2x32xf32>
    %183 = vector.extract_strided_slice %179 {offsets = [0, 32], sizes = [2, 32], strides = [1, 1]} : vector<2x96xf32> to vector<2x32xf32>
    %184 = vector.extract_strided_slice %179 {offsets = [0, 64], sizes = [2, 32], strides = [1, 1]} : vector<2x96xf32> to vector<2x32xf32>
    %185 = arith.mulf %183, %147 : vector<2x32xf32>
    %186 = arith.mulf %182, %181 : vector<2x32xf32>
    %187 = arith.addf %185, %186 : vector<2x32xf32>
    %188 = math.tanh %187 : vector<2x32xf32>
    %189 = arith.mulf %184, %188 : vector<2x32xf32>
    %cst_36 = arith.constant dense<0.000000e+00> : vector<2x128xf32>
    %190 = tpu.matmul %189, %1, %cst_36 {dimension_numbers = #tpu.dot_dimension_numbers<[1], [0], [0], [1], [0, 0, 1, 1], [], []>} : vector<2x32xf32>, vector<32x128xf32>, vector<2x128xf32> -> vector<2x128xf32>
    %cst_37 = arith.constant dense<0.000000e+00> : vector<2x128xf32>
    %191 = tpu.matmul %170, %2, %cst_37 {dimension_numbers = #tpu.dot_dimension_numbers<[1], [0], [0], [1], [0, 0, 1, 1], [], []>} : vector<2x32xf32>, vector<32x128xf32>, vector<2x128xf32> -> vector<2x128xf32>
    %192 = arith.addf %190, %191 : vector<2x128xf32>
    %193 = vector.broadcast %3 : vector<1x128xf32> to vector<2x128xf32>
    %194 = arith.addf %192, %193 : vector<2x128xf32>
    %195 = vector.extract_strided_slice %194 {offsets = [0, 0], sizes = [2, 96], strides = [1, 1]} : vector<2x128xf32> to vector<2x96xf32>
    %196 = arith.negf %195 : vector<2x96xf32>
    %197 = math.exp %196 : vector<2x96xf32>
    %cst_38 = arith.constant 1.000000e+00 : f32
    %198 = vector.broadcast %cst_38 : f32 to vector<2x96xf32>
    %199 = arith.addf %198, %197 : vector<2x96xf32>
    %200 = arith.divf %198, %199 : vector<2x96xf32>
    %201 = vector.extract_strided_slice %194 {offsets = [0, 96], sizes = [2, 32], strides = [1, 1]} : vector<2x128xf32> to vector<2x32xf32>
    %202 = math.tanh %201 : vector<2x32xf32>
    %203 = vector.extract_strided_slice %200 {offsets = [0, 0], sizes = [2, 32], strides = [1, 1]} : vector<2x96xf32> to vector<2x32xf32>
    %204 = vector.extract_strided_slice %200 {offsets = [0, 32], sizes = [2, 32], strides = [1, 1]} : vector<2x96xf32> to vector<2x32xf32>
    %205 = vector.extract_strided_slice %200 {offsets = [0, 64], sizes = [2, 32], strides = [1, 1]} : vector<2x96xf32> to vector<2x32xf32>
    %206 = arith.mulf %204, %168 : vector<2x32xf32>
    %207 = arith.mulf %203, %202 : vector<2x32xf32>
    %208 = arith.addf %206, %207 : vector<2x32xf32>
    %209 = math.tanh %208 : vector<2x32xf32>
    %210 = arith.mulf %205, %209 : vector<2x32xf32>
    %211 = vector.extract_strided_slice %10 {offsets = [10, 0], sizes = [2, 128], strides = [1, 1]} : vector<16x128xf32> to vector<2x128xf32>
    %cst_39 = arith.constant dense<0.000000e+00> : vector<2x128xf32>
    %212 = tpu.matmul %189, %0, %cst_39 {dimension_numbers = #tpu.dot_dimension_numbers<[1], [0], [0], [1], [0, 0, 1, 1], [], []>} : vector<2x32xf32>, vector<32x128xf32>, vector<2x128xf32> -> vector<2x128xf32>
    %213 = arith.addf %211, %212 : vector<2x128xf32>
    %214 = vector.extract_strided_slice %213 {offsets = [0, 0], sizes = [2, 96], strides = [1, 1]} : vector<2x128xf32> to vector<2x96xf32>
    %215 = arith.negf %214 : vector<2x96xf32>
    %216 = math.exp %215 : vector<2x96xf32>
    %cst_40 = arith.constant 1.000000e+00 : f32
    %217 = vector.broadcast %cst_40 : f32 to vector<2x96xf32>
    %218 = arith.addf %217, %216 : vector<2x96xf32>
    %219 = arith.divf %217, %218 : vector<2x96xf32>
    %220 = vector.extract_strided_slice %213 {offsets = [0, 96], sizes = [2, 32], strides = [1, 1]} : vector<2x128xf32> to vector<2x32xf32>
    %221 = math.tanh %220 : vector<2x32xf32>
    %222 = vector.extract_strided_slice %219 {offsets = [0, 0], sizes = [2, 32], strides = [1, 1]} : vector<2x96xf32> to vector<2x32xf32>
    %223 = vector.extract_strided_slice %219 {offsets = [0, 32], sizes = [2, 32], strides = [1, 1]} : vector<2x96xf32> to vector<2x32xf32>
    %224 = vector.extract_strided_slice %219 {offsets = [0, 64], sizes = [2, 32], strides = [1, 1]} : vector<2x96xf32> to vector<2x32xf32>
    %225 = arith.mulf %223, %187 : vector<2x32xf32>
    %226 = arith.mulf %222, %221 : vector<2x32xf32>
    %227 = arith.addf %225, %226 : vector<2x32xf32>
    %228 = math.tanh %227 : vector<2x32xf32>
    %229 = arith.mulf %224, %228 : vector<2x32xf32>
    %cst_41 = arith.constant dense<0.000000e+00> : vector<2x128xf32>
    %230 = tpu.matmul %229, %1, %cst_41 {dimension_numbers = #tpu.dot_dimension_numbers<[1], [0], [0], [1], [0, 0, 1, 1], [], []>} : vector<2x32xf32>, vector<32x128xf32>, vector<2x128xf32> -> vector<2x128xf32>
    %cst_42 = arith.constant dense<0.000000e+00> : vector<2x128xf32>
    %231 = tpu.matmul %210, %2, %cst_42 {dimension_numbers = #tpu.dot_dimension_numbers<[1], [0], [0], [1], [0, 0, 1, 1], [], []>} : vector<2x32xf32>, vector<32x128xf32>, vector<2x128xf32> -> vector<2x128xf32>
    %232 = arith.addf %230, %231 : vector<2x128xf32>
    %233 = vector.broadcast %3 : vector<1x128xf32> to vector<2x128xf32>
    %234 = arith.addf %232, %233 : vector<2x128xf32>
    %235 = vector.extract_strided_slice %234 {offsets = [0, 0], sizes = [2, 96], strides = [1, 1]} : vector<2x128xf32> to vector<2x96xf32>
    %236 = arith.negf %235 : vector<2x96xf32>
    %237 = math.exp %236 : vector<2x96xf32>
    %cst_43 = arith.constant 1.000000e+00 : f32
    %238 = vector.broadcast %cst_43 : f32 to vector<2x96xf32>
    %239 = arith.addf %238, %237 : vector<2x96xf32>
    %240 = arith.divf %238, %239 : vector<2x96xf32>
    %241 = vector.extract_strided_slice %234 {offsets = [0, 96], sizes = [2, 32], strides = [1, 1]} : vector<2x128xf32> to vector<2x32xf32>
    %242 = math.tanh %241 : vector<2x32xf32>
    %243 = vector.extract_strided_slice %240 {offsets = [0, 0], sizes = [2, 32], strides = [1, 1]} : vector<2x96xf32> to vector<2x32xf32>
    %244 = vector.extract_strided_slice %240 {offsets = [0, 32], sizes = [2, 32], strides = [1, 1]} : vector<2x96xf32> to vector<2x32xf32>
    %245 = vector.extract_strided_slice %240 {offsets = [0, 64], sizes = [2, 32], strides = [1, 1]} : vector<2x96xf32> to vector<2x32xf32>
    %246 = arith.mulf %244, %208 : vector<2x32xf32>
    %247 = arith.mulf %243, %242 : vector<2x32xf32>
    %248 = arith.addf %246, %247 : vector<2x32xf32>
    %249 = math.tanh %248 : vector<2x32xf32>
    %250 = arith.mulf %245, %249 : vector<2x32xf32>
    %251 = vector.extract_strided_slice %10 {offsets = [12, 0], sizes = [2, 128], strides = [1, 1]} : vector<16x128xf32> to vector<2x128xf32>
    %cst_44 = arith.constant dense<0.000000e+00> : vector<2x128xf32>
    %252 = tpu.matmul %229, %0, %cst_44 {dimension_numbers = #tpu.dot_dimension_numbers<[1], [0], [0], [1], [0, 0, 1, 1], [], []>} : vector<2x32xf32>, vector<32x128xf32>, vector<2x128xf32> -> vector<2x128xf32>
    %253 = arith.addf %251, %252 : vector<2x128xf32>
    %254 = vector.extract_strided_slice %253 {offsets = [0, 0], sizes = [2, 96], strides = [1, 1]} : vector<2x128xf32> to vector<2x96xf32>
    %255 = arith.negf %254 : vector<2x96xf32>
    %256 = math.exp %255 : vector<2x96xf32>
    %cst_45 = arith.constant 1.000000e+00 : f32
    %257 = vector.broadcast %cst_45 : f32 to vector<2x96xf32>
    %258 = arith.addf %257, %256 : vector<2x96xf32>
    %259 = arith.divf %257, %258 : vector<2x96xf32>
    %260 = vector.extract_strided_slice %253 {offsets = [0, 96], sizes = [2, 32], strides = [1, 1]} : vector<2x128xf32> to vector<2x32xf32>
    %261 = math.tanh %260 : vector<2x32xf32>
    %262 = vector.extract_strided_slice %259 {offsets = [0, 0], sizes = [2, 32], strides = [1, 1]} : vector<2x96xf32> to vector<2x32xf32>
    %263 = vector.extract_strided_slice %259 {offsets = [0, 32], sizes = [2, 32], strides = [1, 1]} : vector<2x96xf32> to vector<2x32xf32>
    %264 = vector.extract_strided_slice %259 {offsets = [0, 64], sizes = [2, 32], strides = [1, 1]} : vector<2x96xf32> to vector<2x32xf32>
    %265 = arith.mulf %263, %227 : vector<2x32xf32>
    %266 = arith.mulf %262, %261 : vector<2x32xf32>
    %267 = arith.addf %265, %266 : vector<2x32xf32>
    %268 = math.tanh %267 : vector<2x32xf32>
    %269 = arith.mulf %264, %268 : vector<2x32xf32>
    %cst_46 = arith.constant dense<0.000000e+00> : vector<2x128xf32>
    %270 = tpu.matmul %269, %1, %cst_46 {dimension_numbers = #tpu.dot_dimension_numbers<[1], [0], [0], [1], [0, 0, 1, 1], [], []>} : vector<2x32xf32>, vector<32x128xf32>, vector<2x128xf32> -> vector<2x128xf32>
    %cst_47 = arith.constant dense<0.000000e+00> : vector<2x128xf32>
    %271 = tpu.matmul %250, %2, %cst_47 {dimension_numbers = #tpu.dot_dimension_numbers<[1], [0], [0], [1], [0, 0, 1, 1], [], []>} : vector<2x32xf32>, vector<32x128xf32>, vector<2x128xf32> -> vector<2x128xf32>
    %272 = arith.addf %270, %271 : vector<2x128xf32>
    %273 = vector.broadcast %3 : vector<1x128xf32> to vector<2x128xf32>
    %274 = arith.addf %272, %273 : vector<2x128xf32>
    %275 = vector.extract_strided_slice %274 {offsets = [0, 0], sizes = [2, 96], strides = [1, 1]} : vector<2x128xf32> to vector<2x96xf32>
    %276 = arith.negf %275 : vector<2x96xf32>
    %277 = math.exp %276 : vector<2x96xf32>
    %cst_48 = arith.constant 1.000000e+00 : f32
    %278 = vector.broadcast %cst_48 : f32 to vector<2x96xf32>
    %279 = arith.addf %278, %277 : vector<2x96xf32>
    %280 = arith.divf %278, %279 : vector<2x96xf32>
    %281 = vector.extract_strided_slice %274 {offsets = [0, 96], sizes = [2, 32], strides = [1, 1]} : vector<2x128xf32> to vector<2x32xf32>
    %282 = math.tanh %281 : vector<2x32xf32>
    %283 = vector.extract_strided_slice %280 {offsets = [0, 0], sizes = [2, 32], strides = [1, 1]} : vector<2x96xf32> to vector<2x32xf32>
    %284 = vector.extract_strided_slice %280 {offsets = [0, 32], sizes = [2, 32], strides = [1, 1]} : vector<2x96xf32> to vector<2x32xf32>
    %285 = vector.extract_strided_slice %280 {offsets = [0, 64], sizes = [2, 32], strides = [1, 1]} : vector<2x96xf32> to vector<2x32xf32>
    %286 = arith.mulf %284, %248 : vector<2x32xf32>
    %287 = arith.mulf %283, %282 : vector<2x32xf32>
    %288 = arith.addf %286, %287 : vector<2x32xf32>
    %289 = math.tanh %288 : vector<2x32xf32>
    %290 = arith.mulf %285, %289 : vector<2x32xf32>
    %291 = vector.extract_strided_slice %10 {offsets = [14, 0], sizes = [2, 128], strides = [1, 1]} : vector<16x128xf32> to vector<2x128xf32>
    %cst_49 = arith.constant dense<0.000000e+00> : vector<2x128xf32>
    %292 = tpu.matmul %269, %0, %cst_49 {dimension_numbers = #tpu.dot_dimension_numbers<[1], [0], [0], [1], [0, 0, 1, 1], [], []>} : vector<2x32xf32>, vector<32x128xf32>, vector<2x128xf32> -> vector<2x128xf32>
    %293 = arith.addf %291, %292 : vector<2x128xf32>
    %294 = vector.extract_strided_slice %293 {offsets = [0, 0], sizes = [2, 96], strides = [1, 1]} : vector<2x128xf32> to vector<2x96xf32>
    %295 = arith.negf %294 : vector<2x96xf32>
    %296 = math.exp %295 : vector<2x96xf32>
    %cst_50 = arith.constant 1.000000e+00 : f32
    %297 = vector.broadcast %cst_50 : f32 to vector<2x96xf32>
    %298 = arith.addf %297, %296 : vector<2x96xf32>
    %299 = arith.divf %297, %298 : vector<2x96xf32>
    %300 = vector.extract_strided_slice %293 {offsets = [0, 96], sizes = [2, 32], strides = [1, 1]} : vector<2x128xf32> to vector<2x32xf32>
    %301 = math.tanh %300 : vector<2x32xf32>
    %302 = vector.extract_strided_slice %299 {offsets = [0, 0], sizes = [2, 32], strides = [1, 1]} : vector<2x96xf32> to vector<2x32xf32>
    %303 = vector.extract_strided_slice %299 {offsets = [0, 32], sizes = [2, 32], strides = [1, 1]} : vector<2x96xf32> to vector<2x32xf32>
    %304 = vector.extract_strided_slice %299 {offsets = [0, 64], sizes = [2, 32], strides = [1, 1]} : vector<2x96xf32> to vector<2x32xf32>
    %305 = arith.mulf %303, %267 : vector<2x32xf32>
    %306 = arith.mulf %302, %301 : vector<2x32xf32>
    %307 = arith.addf %305, %306 : vector<2x32xf32>
    %308 = math.tanh %307 : vector<2x32xf32>
    %309 = arith.mulf %304, %308 : vector<2x32xf32>
    %cst_51 = arith.constant dense<0.000000e+00> : vector<2x128xf32>
    %310 = tpu.matmul %309, %1, %cst_51 {dimension_numbers = #tpu.dot_dimension_numbers<[1], [0], [0], [1], [0, 0, 1, 1], [], []>} : vector<2x32xf32>, vector<32x128xf32>, vector<2x128xf32> -> vector<2x128xf32>
    %cst_52 = arith.constant dense<0.000000e+00> : vector<2x128xf32>
    %311 = tpu.matmul %290, %2, %cst_52 {dimension_numbers = #tpu.dot_dimension_numbers<[1], [0], [0], [1], [0, 0, 1, 1], [], []>} : vector<2x32xf32>, vector<32x128xf32>, vector<2x128xf32> -> vector<2x128xf32>
    %312 = arith.addf %310, %311 : vector<2x128xf32>
    %313 = vector.broadcast %3 : vector<1x128xf32> to vector<2x128xf32>
    %314 = arith.addf %312, %313 : vector<2x128xf32>
    %315 = vector.extract_strided_slice %314 {offsets = [0, 0], sizes = [2, 96], strides = [1, 1]} : vector<2x128xf32> to vector<2x96xf32>
    %316 = arith.negf %315 : vector<2x96xf32>
    %317 = math.exp %316 : vector<2x96xf32>
    %cst_53 = arith.constant 1.000000e+00 : f32
    %318 = vector.broadcast %cst_53 : f32 to vector<2x96xf32>
    %319 = arith.addf %318, %317 : vector<2x96xf32>
    %320 = arith.divf %318, %319 : vector<2x96xf32>
    %321 = vector.extract_strided_slice %314 {offsets = [0, 96], sizes = [2, 32], strides = [1, 1]} : vector<2x128xf32> to vector<2x32xf32>
    %322 = math.tanh %321 : vector<2x32xf32>
    %323 = vector.extract_strided_slice %320 {offsets = [0, 0], sizes = [2, 32], strides = [1, 1]} : vector<2x96xf32> to vector<2x32xf32>
    %324 = vector.extract_strided_slice %320 {offsets = [0, 32], sizes = [2, 32], strides = [1, 1]} : vector<2x96xf32> to vector<2x32xf32>
    %325 = vector.extract_strided_slice %320 {offsets = [0, 64], sizes = [2, 32], strides = [1, 1]} : vector<2x96xf32> to vector<2x32xf32>
    %326 = arith.mulf %324, %288 : vector<2x32xf32>
    %327 = arith.mulf %323, %322 : vector<2x32xf32>
    %328 = arith.addf %326, %327 : vector<2x32xf32>
    %329 = math.tanh %328 : vector<2x32xf32>
    %330 = arith.mulf %325, %329 : vector<2x32xf32>
    %cst_54 = arith.constant dense<0.000000e+00> : vector<2xf32>
    %331 = vector.multi_reduction <add>, %330, %cst_54 [1] : vector<2x32xf32> to vector<2xf32>
    %332 = vector.shape_cast %331 : vector<2xf32> to vector<2x1xf32>
    %cst_55 = arith.constant 3.200000e+01 : f32
    %333 = vector.broadcast %cst_55 : f32 to vector<2x1xf32>
    %334 = arith.divf %332, %333 : vector<2x1xf32>
    %335 = vector.broadcast %334 : vector<2x1xf32> to vector<2x32xf32>
    %336 = arith.subf %330, %335 : vector<2x32xf32>
    %337 = arith.mulf %336, %336 : vector<2x32xf32>
    %cst_56 = arith.constant dense<0.000000e+00> : vector<2xf32>
    %338 = vector.multi_reduction <add>, %337, %cst_56 [1] : vector<2x32xf32> to vector<2xf32>
    %339 = vector.shape_cast %338 : vector<2xf32> to vector<2x1xf32>
    %cst_57 = arith.constant 3.200000e+01 : f32
    %340 = vector.broadcast %cst_57 : f32 to vector<2x1xf32>
    %341 = arith.divf %339, %340 : vector<2x1xf32>
    %342 = vector.broadcast %334 : vector<2x1xf32> to vector<2x32xf32>
    %343 = arith.subf %330, %342 : vector<2x32xf32>
    %cst_58 = arith.constant 9.99999974E-6 : f32
    %344 = vector.broadcast %cst_58 : f32 to vector<2x1xf32>
    %345 = arith.addf %341, %344 : vector<2x1xf32>
    %346 = math.rsqrt %345 : vector<2x1xf32>
    %347 = vector.broadcast %346 : vector<2x1xf32> to vector<2x32xf32>
    %348 = arith.mulf %343, %347 : vector<2x32xf32>
    %c0_59 = arith.constant 0 : index
    %c0_60 = arith.constant 0 : index
    %349 = vector.load %arg8[%c0_59, %c0_60] : memref<1x32xf32, #tpu.memory_space<vmem>>, vector<1x32xf32>
    %350 = vector.broadcast %349 : vector<1x32xf32> to vector<2x32xf32>
    %351 = arith.mulf %348, %350 : vector<2x32xf32>
    %c0_61 = arith.constant 0 : index
    %c0_62 = arith.constant 0 : index
    %352 = vector.load %arg9[%c0_61, %c0_62] : memref<1x32xf32, #tpu.memory_space<vmem>>, vector<1x32xf32>
    %353 = vector.broadcast %352 : vector<1x32xf32> to vector<2x32xf32>
    %354 = arith.addf %351, %353 : vector<2x32xf32>
    %c0_63 = arith.constant 0 : index
    %c0_64 = arith.constant 0 : index
    %355 = vector.load %arg10[%c0_63, %c0_64] : memref<32x3xf32, #tpu.memory_space<vmem>>, vector<32x3xf32>
    %cst_65 = arith.constant dense<0.000000e+00> : vector<2x3xf32>
    %356 = tpu.matmul %354, %355, %cst_65 {dimension_numbers = #tpu.dot_dimension_numbers<[1], [0], [0], [1], [0, 0, 1, 1], [], []>} : vector<2x32xf32>, vector<32x3xf32>, vector<2x3xf32> -> vector<2x3xf32>
    %c0_66 = arith.constant 0 : index
    %c0_67 = arith.constant 0 : index
    %357 = vector.load %arg1[%c0_66, %c0_67] : memref<2x2xf32, #tpu.memory_space<vmem>>, vector<2x1xf32>
    %c0_68 = arith.constant 0 : index
    %c0_69 = arith.constant 0 : index
    %358 = vector.load %arg11[%c0_68, %c0_69] : memref<2x3xf32, #tpu.memory_space<vmem>>, vector<1x3xf32>
    %359 = vector.broadcast %357 : vector<2x1xf32> to vector<2x3xf32>
    %360 = vector.broadcast %358 : vector<1x3xf32> to vector<2x3xf32>
    %361 = arith.mulf %359, %360 : vector<2x3xf32>
    %362 = arith.addf %356, %361 : vector<2x3xf32>
    %c0_70 = arith.constant 0 : index
    %c1 = arith.constant 1 : index
    %363 = vector.load %arg1[%c0_70, %c1] : memref<2x2xf32, #tpu.memory_space<vmem>>, vector<2x1xf32>
    %c1_71 = arith.constant 1 : index
    %c0_72 = arith.constant 0 : index
    %364 = vector.load %arg11[%c1_71, %c0_72] : memref<2x3xf32, #tpu.memory_space<vmem>>, vector<1x3xf32>
    %365 = vector.broadcast %363 : vector<2x1xf32> to vector<2x3xf32>
    %366 = vector.broadcast %364 : vector<1x3xf32> to vector<2x3xf32>
    %367 = arith.mulf %365, %366 : vector<2x3xf32>
    %368 = arith.addf %362, %367 : vector<2x3xf32>
    %c0_73 = arith.constant 0 : index
    %c0_74 = arith.constant 0 : index
    %369 = vector.load %arg12[%c0_73, %c0_74] : memref<1x3xf32, #tpu.memory_space<vmem>>, vector<1x3xf32>
    %370 = vector.broadcast %369 : vector<1x3xf32> to vector<2x3xf32>
    %371 = arith.addf %368, %370 : vector<2x3xf32>
    %c0_75 = arith.constant 0 : index
    %c0_76 = arith.constant 0 : index
    %372 = vector.load %arg13[%c0_75, %c0_76] : memref<2x3xf32, #tpu.memory_space<vmem>>, vector<2x3xf32>
    tpu.vector_store %arg13[%c0_75, %c0_76], %371 {strides = array<i32>} : memref<2x3xf32, #tpu.memory_space<vmem>>, vector<2x3xf32>,
    return
  }
}

</mosaic_0001>

<bundles_post_ra>
// kernel: tpu_custom_call.1
= control target key start
LH: loop header
LB: loop body
LE: loop exit
PB: predicated region body
PF: predicated region fallthrough
CT: control target
= control target key end

     0   :  { %18 = vsyncpa [#allocation3], 0  ;;  %s3903_s0 = inlined_call_operand.vmem [shape: f32[16,4], index: 0, kind: input, shape index: {}]   ;;  %s3904_s1 = inlined_call_operand.vmem [shape: f32[2,2], index: 1, kind: input, shape index: {}]   ;;  %s3905_s2 = inlined_call_operand.hbm [shape: f32[4,128], index: 2, kind: input, shape index: {}]   ;;  %s3906_s3 = inlined_call_operand.vmem [shape: f32[32,128], index: 3, kind: input, shape index: {}]   ;;  %s3907_s4 = inlined_call_operand.vmem [shape: f32[1,128], index: 4, kind: input, shape index: {}]   ;;  %s3908_s5 = inlined_call_operand.vmem [shape: f32[32,128], index: 5, kind: input, shape index: {}]   ;;  %s3909_s6 = inlined_call_operand.hbm [shape: f32[32,128], index: 6, kind: input, shape index: {}]   ;;  %s3910_s7 = inlined_call_operand.vmem [shape: f32[1,128], index: 7, kind: input, shape index: {}]   ;;  %s3911_s8 = inlined_call_operand.vmem [shape: f32[1,32], index: 8, kind: input, shape index: {}]   ;;  %s3912_s9 = inlined_call_operand.vmem [shape: f32[1,32], index: 9, kind: input, shape index: {}]   ;;  %s3913_s10 = inlined_call_operand.vmem [shape: f32[32,3], index: 10, kind: input, shape index: {}]   ;;  %s3914_s11 = inlined_call_operand.vmem [shape: f32[2,3], index: 11, kind: input, shape index: {}]   ;;  %s3915_s12 = inlined_call_operand.vmem [shape: f32[1,3], index: 12, kind: input, shape index: {}]   ;;  %s3916_s13 = inlined_call_operand.hbm [shape: f32[2,3], index: 13, kind: output, shape index: {}]  }
   0x1   :  { %19 = vsyncpa [#allocation6], 0 }
   0x2   :  { %20 = vsyncpa [#allocation4], 0  ;;  %s3385_s25 = smov [#allocation2]   ;;  %s3386_s27 = smov [#allocation5]  }
   0x3   :  { %s31_s26 = sshll.u32 %s3385_s25, 4  ;;  %s46_s28 = sshll.u32 %s3386_s27, 4  ;;  %s32_s26 = int_to_ptr.vmem [resolvable:$true] %s31_s26  ;;  %s3467_s28 = int_to_ptr.vmem [resolvable:$true] %s46_s28 }
   0x4   :  { %s3313_s14 = scalar_lea.hbm %s3905_s2, 64 }
   0x5   :  { %p3314_p0 = scmp.ne.s32.totalorder %s3905_s2, %s3313_s14  ;;  %p3317_p1 = scmp.lt.u32.totalorder %s3313_s14, %s3905_s2 }
   0x7   :  { %p3319_p2 = pnand %p3317_p1, %p3314_p0 }
   0x9   :  { %3322 = shalt.err (!%p3319_p2)
}
   0xa   :  { %s3323_s19 = scalar_lea.vmem %s32_s26, 64  ;;  %p3328_p4 = scmp.lt.s32.totalorder %s32_s26, %s32_s26 }
   0xb   :  { %p3324_p3 = scmp.ne.s32.totalorder %s32_s26, %s3323_s19  ;;  %p3329_p5 = scmp.lt.s32.totalorder %s3323_s19, %s3323_s19 }
   0xd   :  { %p3330_p6 = por %p3329_p5, %p3328_p4 }
   0xf   :  { %p3331_p7 = pnand %p3330_p6, %p3324_p3 }
  0x11   :  { %3334 = shalt.err (!%p3331_p7)
}
  0x12   :  { %34 = dma.hbm_to_vmem [thread:$0]  %s3905_s2, 64, %s32_s26, [#allocation3]  }
  0x13   :  { %s3335_s24 = scalar_lea.hbm %s3909_s6, 512 }
  0x14   :  { %p3336_p8 = scmp.ne.s32.totalorder %s3909_s6, %s3335_s24  ;;  %p3339_p9 = scmp.lt.u32.totalorder %s3335_s24, %s3909_s6 }
  0x16   :  { %p3341_p10 = pnand %p3339_p9, %p3336_p8 }
  0x18   :  { %3344 = shalt.err (!%p3341_p10)
}
  0x19   :  { %s3345_s14 = scalar_lea.vmem %s3467_s28, 512  ;;  %p3350_p12 = scmp.lt.s32.totalorder %s3467_s28, %s3467_s28 }
  0x1a   :  { %p3346_p11 = scmp.ne.s32.totalorder %s3467_s28, %s3345_s14  ;;  %p3351_p13 = scmp.lt.s32.totalorder %s3345_s14, %s3345_s14 }
  0x1c   :  { %p3352_p0 = por %p3351_p13, %p3350_p12 }
  0x1e   :  { %p3353_p1 = pnand %p3352_p0, %p3346_p11 }
  0x20   :  { %3356 = shalt.err (!%p3353_p1)
}
  0x21   :  { %s3387_s2 = smov 128   ;;  %s3388_s26 = smov 8  }
  0x22   :  { %52 = dma.hbm_to_vmem [thread:$0]  %s3909_s6, 512, %s3467_s28, [#allocation6], %s3387_s2, %s3387_s2, %s3388_s26  }
  0x23   :  { %3379 = dma.done.wait [#allocation3], 64  }
  0x24   :  { %3380 = vsyncadd [#allocation3], 4294967232 }
  0x25   :  { %3381 = dma.done.wait [#allocation6], 512  }
  0x26   :  { %3382 = vsyncadd [#allocation6], 4294966784  ;;  %v3389_v0 = vmov 0.0|0.0   ;;  %vm3390_vm0 = vmmov 0   ;;  %v3391_v1 = vmov 0.0   ;;  %vm101_vm1 = vcmask 1043456  }
  0x27   :  { %3018 = vmatprep.subr.bf16.mxu1 %v3389_v0  ;;  %2751 = vmatprep.mubr.msk.f32.mxu1 %vm3390_vm0, %v3391_v1  ;;  %vm94_vm2 = vcmask 31744   ;;  %v71_v2 = vld [vmem:[%s3906_s3] sm:$0xff]  ;;  %v72_v3 = vld [vmem:[%s3906_s3 + $0x8] sm:$0xff]  ;;  %v86_v4 = vld [vmem:[#allocation2] sm:$0xf]  ;;  %s3392_s29 = smov 32  }
  0x28   :  { %v3507_v5 = vpack.c.bf16 %v72_v3, %v71_v2  ;;  %2738 = vmatprep.subr.msk.mxu0 %vm101_vm1, %v86_v4  ;;  %v84_v6 = vld [vmem:[%s3903_s0] sm:$0xff]  ;;  %v85_v7 = vld [vmem:[%s3903_s0 + $0x8] sm:$0xff]  ;;  %v73_v8 = vld [vmem:[%s3906_s3 + $0x10] sm:$0xff]  ;;  %vm180_vm3 = vcmask 261120   ;;  %vm2394_vm4 = vcmask 254976   ;;  %s3396_s2 = smov [#allocation7]  }
  0x29   :  { %2739 = vmatpush3.msk.msra.mxu0 %vm101_vm1, %v86_v4  ;;  %2740 = vmatprep.mubr.msk.f32.mxu0 %vm94_vm2, %v84_v6  ;;  %v74_v9 = vld [vmem:[%s3906_s3 + $0x18] sm:$0xff]  ;;  %v2561_v11 = vld [vmem:[%s3907_s4] ss:$0 sm:$0xff]  ;;  %v81_v31 = vld [vmem:[#allocation5 + $0x10] sm:$0xff]  ;;  %s2551_s26 = sshll.u32 %s3396_s2, 4  ;;  %vm2543_vm5 = vcmask 17408   ;;  %s2552_s26 = int_to_ptr.vmem [resolvable:$true] %s2551_s26 }
  0x2a   :  { %3020 = vmatpush3.bf16.msra.mxu1 %v3507_v5  ;;  %2741 = vmatmul.mubr.msk.f32.vlgmr.msra.gmra.mrb[0].mxu0 %vm94_vm2, %v85_v7  ;;  %v3522_v10 = vpack.c.bf16 %v74_v9, %v73_v8  ;;  %v79_v29 = vld [vmem:[#allocation5] sm:$0xff]  ;;  %v80_v30 = vld [vmem:[#allocation5 + $0x8] sm:$0xff]  ;;  %v82_v33 = vld [vmem:[#allocation5 + $0x18] sm:$0xff]  ;;  %s3357_s15 = scalar_lea.vmem %s2552_s26, 32  ;;  %p3362_p3 = scmp.lt.s32.totalorder %s2552_s26, %s2552_s26 }
  0x2b   :  { %3021 = vmatprep.subr.bf16.mxu1 %v3389_v0  ;;  %3024 = vmatprep.subr.bf16.mxu0 %v3389_v0  ;;  %v3546_v32 = vpack.c.bf16 %v80_v30, %v79_v29  ;;  %v75_v34 = vld [vmem:[%s3908_s5] sm:$0xff]  ;;  %v76_v35 = vld [vmem:[%s3908_s5 + $0x8] sm:$0xff]  ;;  %v77_v37 = vld [vmem:[%s3908_s5 + $0x10] sm:$0xff]  ;;  %v3563_v39 = vpack.c.bf16 %v82_v33, %v81_v31  ;;  %p3358_p2 = scmp.ne.s32.totalorder %s2552_s26, %s3357_s15  ;;  %p3363_p4 = scmp.lt.s32.totalorder %s3357_s15, %s3357_s15 }
  0x2c   :  { %2762 = vmatprep.mubr.msk.f32.mxu0 %vm3390_vm0, %v3391_v1  ;;  %v3554_v36 = vpack.c.bf16 %v76_v35, %v75_v34  ;;  %v78_v38 = vld [vmem:[%s3908_s5 + $0x18] sm:$0xff]  ;;  %s3393_s5 = smov 64   ;;  %v3600_v47 = vld [vmem:[%s3910_s7] ss:$0 sm:$0xff] }
  0x2d   :  { %3026 = vmatpush3.bf16.msra.mxu0 %v3546_v32  ;;  %v3567_v40 = vpack.c.bf16 %v78_v38, %v77_v37  ;;  %p3364_p5 = por %p3363_p4, %p3362_p3 }
  0x2e   :  { %3023 = vmatpush3.bf16.msra.mxu1 %v3522_v10  ;;  %3027 = vmatprep.subr.bf16.mxu0 %v3389_v0 }
  0x2f   :  { %3030 = vmatprep.subr.bf16.mxu1 %v3389_v0  ;;  %p3365_p6 = pnand %p3364_p5, %p3358_p2 }
  0x31   :  { %2752 = vmatmul.mubr.f32.vlgmr.msra.gmra.mrb[0].mxu1 %v3391_v1  ;;  %3029 = vmatpush3.bf16.msra.mxu0 %v3563_v39 }
  0x32   :  { %2773 = vmatprep.mubr.msk.f32.mxu1 %vm3390_vm0, %v3391_v1  ;;  %3032 = vmatpush3.bf16.msra.mxu1 %v3554_v36 }
  0x33   :  { %3033 = vmatprep.subr.bf16.mxu1 %v3389_v0  ;;  %3036 = vmatprep.subr.bf16.mxu0 %v3389_v0 }
  0x34   :  { %2763 = vmatmul.mubr.f32.vlgmr.msra.gmra.mrb[2].mxu0 %v3391_v1 }
  0x35   :  { %3038 = vmatpush3.bf16.msra.mxu0 %v3507_v5  ;;  %2784 = vmatprep.mubr.msk.f32.mxu0 %vm3390_vm0, %v3391_v1 }
  0x36   :  { %3035 = vmatpush3.bf16.msra.mxu1 %v3567_v40  ;;  %3039 = vmatprep.subr.bf16.mxu0 %v3389_v0 }
  0x37   :  { %3042 = vmatprep.subr.bf16.mxu1 %v3389_v0 }
  0x39   :  { %3041 = vmatpush3.bf16.msra.mxu0 %v3522_v10 }
  0x3a   :  { %3048 = vmatprep.subr.bf16.mxu0 %v3389_v0 }
  0xfd   :  { %v2742_v12 = vpop.f32.mrb[0].mxu0 }
  0xfe   :  { %v3536_v13 = vadd.f32 %v2742_v12, %v2561_v11  ;;  %v171_v14 = vpop.f32.mrb[1].mxu0 }
  0xff   :  { %v3538_v15 = vadd.f32 %v2561_v11, %v171_v14 }
 0x104   :  { %v250_v16 = vpop.f32.mrb[0].mxu1 }
 0x105   :  { %v254_v17 = vadd.f32 %v250_v16, %v3538_v15  ;;  %v2753_v18 = vpop.f32.mrb[1].mxu1 }
 0x107   :  { %3183 = vtanh.f32 %v254_v17  ;;  %v2565_v20 = vmul.f32 -1.442695, %v254_v17  ;;  %v345_v44 = vpop.f32.mrb[2].mxu0 }
 0x108   :  { %v2764_v45 = vpop.f32.mrb[3].mxu0 }
 0x109   :  { %3185 = vpow2.f32 %v2565_v20 }
 0x111   :  { %v3184_v19 = vpop.eup %3183 }
 0x112   :  { %264 = vrot.lane.b32.xlu0 %v3184_v19, %s3392_s29 }
 0x113   :  { %v3186_v21 = vpop.eup %3185 }
 0x114   :  { %v258_v22 = vadd.f32 1.0, %v3186_v21 }
 0x116   :  { %3187 = vrcp.f32 %v258_v22 }
 0x120   :  { %v3188_v23 = vpop.eup %3187 }
 0x121   :  { %v262_v26 = vmul.f32 0.0, %v3188_v23 }
 0x184   :  { %v265_v24 = vpop.permute.xlu0 %264 }
 0x185   :  { %v267_v25 = vmul.f32 %v3188_v23, %v265_v24 }
 0x187   :  { %269 = vrot.lane.b32.xlu0 %v267_v25, %s3392_s29 }
 0x1f9   :  { %v270_v27 = vpop.permute.xlu0 %269 }
 0x1fa   :  { %v3543_v28 = vadd.f32 %v270_v27, %v262_v26 }
 0x1fc   :  { %3189 = vtanh.f32 %v3543_v28  ;;  %v537_v9 = vrot.slane %v3543_v28, 6 }
 0x206   :  { %v3190_v41 = vpop.eup %3189 }
 0x207   :  { %275 = vrot.lane.b32.xlu1 %v3190_v41, %s3392_s29 }
 0x279   :  { %v276_v42 = vpop.permute.xlu1 %275 }
 0x27a   :  { %v278_v43 = vmul.f32 %v3188_v23, %v276_v42 }
 0x27c   :  { %350 = vrot.lane.b32.xlu1 %v278_v43, %s3393_s5 }
 0x2ee   :  { %v351_v46 = vpop.permute.xlu1 %350 }
 0x2ef   :  { %2774 = vmatmul.mubr.msk.f32.vlgmr.msra.gmra.mrb[2].mxu1 %vm180_vm3, %v351_v46  ;;  %2785 = vmatmul.mubr.msk.f32.vlgmr.msra.gmra.mrb[4].mxu0 %vm180_vm3, %v351_v46 }
 0x2f0   :  { %3044 = vmatpush3.bf16.msra.mxu1 %v3546_v32  ;;  %3050 = vmatpush3.bf16.msra.mxu0 %v3554_v36 }
 0x2f1   :  { %3045 = vmatprep.subr.bf16.mxu1 %v3389_v0  ;;  %3051 = vmatprep.subr.bf16.mxu0 %v3389_v0 }
 0x2f2   :  { %2795 = vmatprep.mubr.msk.f32.mxu1 %vm3390_vm0, %v3391_v1  ;;  %2806 = vmatprep.mubr.msk.f32.mxu0 %vm3390_vm0, %v3391_v1 }
 0x2f4   :  { %3047 = vmatpush3.bf16.msra.mxu1 %v3563_v39  ;;  %3053 = vmatpush3.bf16.msra.mxu0 %v3567_v40 }
 0x2f5   :  { %3054 = vmatprep.subr.bf16.mxu1 %v3389_v0  ;;  %3060 = vmatprep.subr.bf16.mxu0 %v3389_v0 }
 0x3c2   :  { %v420_v48 = vpop.f32.mrb[2].mxu1  ;;  %v521_v49 = vpop.f32.mrb[4].mxu0 }
 0x3c3   :  { %v421_v50 = vadd.f32 %v420_v48, %v345_v44  ;;  %v526_v51 = vrot.slane %v521_v49, 6  ;;  %v2775_v52 = vpop.f32.mrb[3].mxu1  ;;  %v2786_v53 = vpop.f32.mrb[5].mxu0 }
 0x3c5   :  { %v430_v54 = vadd.f32 %v3600_v47, %v421_v50  ;;  %v528_v55 = vadd.f32 %v526_v51, %v3538_v15 }
 0x3c7   :  { %3191 = vtanh.f32 %v430_v54  ;;  %v2568_v58 = vmul.f32 -1.442695, %v430_v54  ;;  %v2570_v59 = vmul.f32 -1.442695, %v528_v55 }
 0x3c8   :  { %3193 = vtanh.f32 %v528_v55 }
 0x3c9   :  { %3195 = vpow2.f32 %v2568_v58 }
 0x3ca   :  { %3197 = vpow2.f32 %v2570_v59 }
 0x3d1   :  { %v3192_v56 = vpop.eup %3191 }
 0x3d2   :  { %v3194_v57 = vpop.eup %3193  ;;  %440 = vrot.lane.b32.xlu0 %v3192_v56, %s3392_s29 }
 0x3d3   :  { %541 = vrot.lane.b32.xlu1 %v3194_v57, %s3392_s29  ;;  %v3196_v60 = vpop.eup %3195 }
 0x3d4   :  { %v3198_v61 = vpop.eup %3197  ;;  %v434_v62 = vadd.f32 1.0, %v3196_v60 }
 0x3d5   :  { %v532_v63 = vadd.f32 1.0, %v3198_v61 }
 0x3d6   :  { %3199 = vrcp.f32 %v434_v62 }
 0x3d7   :  { %3201 = vrcp.f32 %v532_v63 }
 0x3e0   :  { %v3200_v2 = vpop.eup %3199 }
 0x3e1   :  { %v3202_v4 = vpop.eup %3201  ;;  %v438_v11 = vmul.f32 0.0, %v3200_v2 }
 0x3e2   :  { %v539_v12 = vmul.f32 %v3202_v4, %v537_v9 }
 0x444   :  { %v441_v3 = vpop.permute.xlu0 %440 }
 0x445   :  { %v542_v6 = vpop.permute.xlu1 %541  ;;  %v443_v7 = vmul.f32 %v3200_v2, %v441_v3 }
 0x446   :  { %v544_v8 = vmul.f32 %v3202_v4, %v542_v6 }
 0x447   :  { %445 = vrot.lane.b32.xlu0 %v443_v7, %s3392_s29 }
 0x448   :  { %546 = vrot.lane.b32.xlu1 %v544_v8, %s3392_s29 }
 0x4b9   :  { %v446_v14 = vpop.permute.xlu0 %445 }
 0x4ba   :  { %v547_v16 = vpop.permute.xlu1 %546  ;;  %v3609_v17 = vadd.f32 %v446_v14, %v438_v11 }
 0x4bb   :  { %v3611_v18 = vadd.f32 %v547_v16, %v539_v12 }
 0x4bc   :  { %3203 = vtanh.f32 %v3609_v17 }
 0x4bd   :  { %3205 = vtanh.f32 %v3611_v18  ;;  %v814_v60 = vrot.slane %v3611_v18, 6 }
 0x4c6   :  { %v3204_v19 = vpop.eup %3203 }
 0x4c7   :  { %v3206_v20 = vpop.eup %3205  ;;  %451 = vrot.lane.b32.xlu0 %v3204_v19, %s3392_s29 }
 0x4c8   :  { %552 = vrot.lane.b32.xlu1 %v3206_v20, %s3392_s29 }
 0x539   :  { %v452_v21 = vpop.permute.xlu0 %451 }
 0x53a   :  { %v553_v22 = vpop.permute.xlu1 %552  ;;  %v454_v23 = vmul.f32 %v3200_v2, %v452_v21 }
 0x53b   :  { %v555_v24 = vmul.f32 %v3202_v4, %v553_v22 }
 0x53c   :  { %557 = vrot.lane.b32.xlu0 %v454_v23, %s3393_s5 }
 0x53d   :  { %v632_v25 = vrot.slane %v555_v24, 2 }
 0x53f   :  { %633 = vrot.lane.b32.xlu1 %v632_v25, %s3393_s5 }
 0x5ae   :  { %v558_v26 = vpop.permute.xlu0 %557 }
 0x5af   :  { %2796 = vmatmul.mubr.msk.f32.vlgmr.msra.gmra.mrb[4].mxu1 %vm180_vm3, %v558_v26 }
 0x5b0   :  { %3056 = vmatpush3.bf16.msra.mxu1 %v3507_v5  ;;  %2817 = vmatprep.mubr.msk.f32.mxu1 %vm3390_vm0, %v3391_v1 }
 0x5b1   :  { %v634_v27 = vpop.permute.xlu1 %633  ;;  %3057 = vmatprep.subr.bf16.mxu1 %v3389_v0 }
 0x5b2   :  { %2807 = vmatmul.mubr.msk.f32.vlgmr.msra.gmra.mrb[6].mxu0 %vm180_vm3, %v634_v27 }
 0x5b3   :  { %3062 = vmatpush3.bf16.msra.mxu0 %v3546_v32  ;;  %2828 = vmatprep.mubr.msk.f32.mxu0 %vm3390_vm0, %v3391_v1 }
 0x5b4   :  { %3059 = vmatpush3.bf16.msra.mxu1 %v3522_v10  ;;  %3063 = vmatprep.subr.bf16.mxu0 %v3389_v0 }
 0x5b5   :  { %3066 = vmatprep.subr.bf16.mxu1 %v3389_v0 }
 0x5b7   :  { %2818 = vmatmul.mubr.msk.f32.vlgmr.msra.gmra.mrb[6].mxu1 %vm180_vm3, %v634_v27  ;;  %3065 = vmatpush3.bf16.msra.mxu0 %v3563_v39 }
 0x5b8   :  { %3072 = vmatprep.subr.bf16.mxu0 %v3389_v0  ;;  %3068 = vmatpush3.bf16.msra.mxu1 %v3554_v36 }
 0x5b9   :  { %3069 = vmatprep.subr.bf16.mxu1 %v3389_v0  ;;  %2839 = vmatprep.mubr.msk.f32.mxu1 %vm3390_vm0, %v3391_v1 }
 0x5bc   :  { %3071 = vmatpush3.bf16.msra.mxu1 %v3567_v40 }
 0x5bd   :  { %3078 = vmatprep.subr.bf16.mxu1 %v3389_v0 }
 0x682   :  { %v627_v28 = vpop.f32.mrb[4].mxu1 }
 0x683   :  { %v2797_v29 = vpop.f32.mrb[5].mxu1 }
 0x685   :  { %v703_v30 = vpop.f32.mrb[6].mxu0 }
 0x686   :  { %v704_v31 = vadd.f32 %v703_v30, %v627_v28  ;;  %v2808_v33 = vpop.f32.mrb[7].mxu0 }
 0x688   :  { %v707_v34 = vadd.f32 %v3600_v47, %v704_v31 }
 0x68a   :  { %3207 = vtanh.f32 %v707_v34  ;;  %v798_v35 = vpop.f32.mrb[6].mxu1  ;;  %v2573_v44 = vmul.f32 -1.442695, %v707_v34 }
 0x68b   :  { %v803_v37 = vrot.slane %v798_v35, 4  ;;  %v2819_v38 = vpop.f32.mrb[7].mxu1 }
 0x68d   :  { %v805_v41 = vadd.f32 %v803_v37, %v3538_v15 }
 0x68f   :  { %3209 = vtanh.f32 %v805_v41  ;;  %v2575_v45 = vmul.f32 -1.442695, %v805_v41 }
 0x690   :  { %3211 = vpow2.f32 %v2573_v44 }
 0x691   :  { %3213 = vpow2.f32 %v2575_v45 }
 0x694   :  { %v3208_v42 = vpop.eup %3207 }
 0x695   :  { %717 = vrot.lane.b32.xlu0 %v3208_v42, %s3392_s29 }
 0x699   :  { %v3210_v43 = vpop.eup %3209 }
 0x69a   :  { %818 = vrot.lane.b32.xlu1 %v3210_v43, %s3392_s29  ;;  %v3212_v46 = vpop.eup %3211 }
 0x69b   :  { %v711_v48 = vadd.f32 1.0, %v3212_v46  ;;  %v3214_v49 = vpop.eup %3213 }
 0x69c   :  { %v809_v50 = vadd.f32 1.0, %v3214_v49 }
 0x69d   :  { %3215 = vrcp.f32 %v711_v48 }
 0x69e   :  { %3217 = vrcp.f32 %v809_v50 }
 0x6a7   :  { %v3216_v51 = vpop.eup %3215 }
 0x6a8   :  { %v3218_v54 = vpop.eup %3217  ;;  %v715_v57 = vmul.f32 %v3216_v51, %v3609_v17 }
 0x6a9   :  { %v816_v61 = vmul.f32 %v3218_v54, %v814_v60 }
 0x707   :  { %v718_v52 = vpop.permute.xlu0 %717 }
 0x708   :  { %v720_v53 = vmul.f32 %v3216_v51, %v718_v52 }
 0x70a   :  { %722 = vrot.lane.b32.xlu0 %v720_v53, %s3392_s29 }
 0x70c   :  { %v819_v55 = vpop.permute.xlu1 %818 }
 0x70d   :  { %v821_v56 = vmul.f32 %v3218_v54, %v819_v55 }
 0x70f   :  { %823 = vrot.lane.b32.xlu1 %v821_v56, %s3392_s29 }
 0x77c   :  { %v723_v58 = vpop.permute.xlu0 %722 }
 0x77d   :  { %v3647_v59 = vadd.f32 %v723_v58, %v715_v57 }
 0x77f   :  { %3219 = vtanh.f32 %v3647_v59 }
 0x781   :  { %v824_v62 = vpop.permute.xlu1 %823 }
 0x782   :  { %v3651_v63 = vadd.f32 %v824_v62, %v816_v61 }
 0x784   :  { %3221 = vtanh.f32 %v3651_v63  ;;  %v1091_v42 = vrot.slane %v3651_v63, 6 }
 0x789   :  { %v3220_v2 = vpop.eup %3219 }
 0x78a   :  { %728 = vrot.lane.b32.xlu0 %v3220_v2, %s3392_s29 }
 0x78e   :  { %v3222_v3 = vpop.eup %3221 }
 0x78f   :  { %829 = vrot.lane.b32.xlu1 %v3222_v3, %s3392_s29 }
 0x7fc   :  { %v729_v4 = vpop.permute.xlu0 %728 }
 0x7fd   :  { %v731_v6 = vmul.f32 %v3216_v51, %v729_v4 }
 0x7ff   :  { %834 = vrot.lane.b32.xlu0 %v731_v6, %s3393_s5 }
 0x801   :  { %v830_v7 = vpop.permute.xlu1 %829 }
 0x802   :  { %v832_v8 = vmul.f32 %v3218_v54, %v830_v7 }
 0x804   :  { %v909_v9 = vrot.slane %v832_v8, 4 }
 0x806   :  { %910 = vrot.lane.b32.xlu1 %v909_v9, %s3393_s5 }
 0x871   :  { %v835_v11 = vpop.permute.xlu0 %834 }
 0x872   :  { %2829 = vmatmul.mubr.msk.f32.vlgmr.msra.gmra.mrb[8].mxu0 %vm180_vm3, %v835_v11 }
 0x873   :  { %3074 = vmatpush3.bf16.msra.mxu0 %v3507_v5  ;;  %2850 = vmatprep.mubr.msk.f32.mxu0 %vm3390_vm0, %v3391_v1 }
 0x874   :  { %3075 = vmatprep.subr.bf16.mxu0 %v3389_v0 }
 0x877   :  { %3077 = vmatpush3.bf16.msra.mxu0 %v3522_v10 }
 0x878   :  { %v911_v12 = vpop.permute.xlu1 %910  ;;  %3084 = vmatprep.subr.bf16.mxu0 %v3389_v0 }
 0x879   :  { %2840 = vmatmul.mubr.msk.f32.vlgmr.msra.gmra.mrb[8].mxu1 %vm180_vm3, %v911_v12 }
 0x87a   :  { %2851 = vmatmul.mubr.msk.f32.vlgmr.msra.gmra.mrb[10].mxu0 %vm180_vm3, %v911_v12  ;;  %3080 = vmatpush3.bf16.msra.mxu1 %v3546_v32 }
 0x87b   :  { %3081 = vmatprep.subr.bf16.mxu1 %v3389_v0  ;;  %3086 = vmatpush3.bf16.msra.mxu0 %v3554_v36 }
 0x87c   :  { %3087 = vmatprep.subr.bf16.mxu0 %v3389_v0  ;;  %2861 = vmatprep.mubr.msk.f32.mxu1 %vm3390_vm0, %v3391_v1 }
 0x87d   :  { %2872 = vmatprep.mubr.msk.f32.mxu0 %vm3390_vm0, %v3391_v1 }
 0x87e   :  { %3083 = vmatpush3.bf16.msra.mxu1 %v3563_v39 }
 0x87f   :  { %3089 = vmatpush3.bf16.msra.mxu0 %v3567_v40  ;;  %3090 = vmatprep.subr.bf16.mxu1 %v3389_v0 }
 0x880   :  { %3096 = vmatprep.subr.bf16.mxu0 %v3389_v0 }
 0x945   :  { %v904_v14 = vpop.f32.mrb[8].mxu0 }
 0x946   :  { %v2830_v16 = vpop.f32.mrb[9].mxu0 }
 0x94c   :  { %v980_v17 = vpop.f32.mrb[8].mxu1 }
 0x94d   :  { %v981_v18 = vadd.f32 %v980_v17, %v904_v14  ;;  %v1075_v19 = vpop.f32.mrb[10].mxu0  ;;  %v2841_v20 = vpop.f32.mrb[9].mxu1 }
 0x94e   :  { %v1080_v21 = vrot.slane %v1075_v19, 2  ;;  %v2852_v22 = vpop.f32.mrb[11].mxu0 }
 0x94f   :  { %v984_v23 = vadd.f32 %v3600_v47, %v981_v18 }
 0x950   :  { %v1082_v24 = vadd.f32 %v1080_v21, %v3538_v15 }
 0x951   :  { %3223 = vtanh.f32 %v984_v23  ;;  %v2578_v27 = vmul.f32 -1.442695, %v984_v23 }
 0x952   :  { %3225 = vtanh.f32 %v1082_v24  ;;  %v2580_v28 = vmul.f32 -1.442695, %v1082_v24 }
 0x953   :  { %3227 = vpow2.f32 %v2578_v27 }
 0x954   :  { %3229 = vpow2.f32 %v2580_v28 }
 0x95b   :  { %v3224_v25 = vpop.eup %3223 }
 0x95c   :  { %v3226_v26 = vpop.eup %3225  ;;  %994 = vrot.lane.b32.xlu1 %v3224_v25, %s3392_s29 }
 0x95d   :  { %1095 = vrot.lane.b32.xlu0 %v3226_v26, %s3392_s29  ;;  %v3228_v29 = vpop.eup %3227 }
 0x95e   :  { %v3230_v30 = vpop.eup %3229  ;;  %v988_v31 = vadd.f32 1.0, %v3228_v29 }
 0x95f   :  { %v1086_v33 = vadd.f32 1.0, %v3230_v30 }
 0x960   :  { %3231 = vrcp.f32 %v988_v31 }
 0x961   :  { %3233 = vrcp.f32 %v1086_v33 }
 0x96a   :  { %v3232_v34 = vpop.eup %3231 }
 0x96b   :  { %v3234_v35 = vpop.eup %3233  ;;  %v992_v43 = vmul.f32 %v3232_v34, %v3647_v59 }
 0x96c   :  { %v1093_v44 = vmul.f32 %v3234_v35, %v1091_v42 }
 0x9ce   :  { %v995_v15 = vpop.permute.xlu1 %994 }
 0x9cf   :  { %v1096_v37 = vpop.permute.xlu0 %1095  ;;  %v997_v38 = vmul.f32 %v3232_v34, %v995_v15 }
 0x9d0   :  { %v1098_v41 = vmul.f32 %v3234_v35, %v1096_v37 }
 0x9d1   :  { %999 = vrot.lane.b32.xlu1 %v997_v38, %s3392_s29 }
 0x9d2   :  { %1100 = vrot.lane.b32.xlu0 %v1098_v41, %s3392_s29 }
 0xa43   :  { %v1000_v45 = vpop.permute.xlu1 %999 }
 0xa44   :  { %v1101_v46 = vpop.permute.xlu0 %1100  ;;  %v3687_v48 = vadd.f32 %v1000_v45, %v992_v43 }
 0xa45   :  { %v3689_v49 = vadd.f32 %v1101_v46, %v1093_v44 }
 0xa46   :  { %3235 = vtanh.f32 %v3687_v48 }
 0xa47   :  { %3237 = vtanh.f32 %v3689_v49  ;;  %v1365_v25 = vrot.slane %v3689_v49, 6 }
 0xa50   :  { %v3236_v50 = vpop.eup %3235 }
 0xa51   :  { %v3238_v51 = vpop.eup %3237  ;;  %1005 = vrot.lane.b32.xlu1 %v3236_v50, %s3392_s29 }
 0xa52   :  { %1106 = vrot.lane.b32.xlu0 %v3238_v51, %s3392_s29 }
 0xac3   :  { %v1006_v52 = vpop.permute.xlu1 %1005 }
 0xac4   :  { %v1107_v53 = vpop.permute.xlu0 %1106  ;;  %v1008_v54 = vmul.f32 %v3232_v34, %v1006_v52 }
 0xac5   :  { %v1109_v55 = vmul.f32 %v3234_v35, %v1107_v53 }
 0xac6   :  { %1111 = vrot.lane.b32.xlu0 %v1008_v54, %s3393_s5 }
 0xac7   :  { %v1186_v56 = vrot.slane %v1109_v55, 6 }
 0xac9   :  { %1187 = vrot.lane.b32.xlu1 %v1186_v56, %s3393_s5 }
 0xb38   :  { %v1112_v57 = vpop.permute.xlu0 %1111 }
 0xb39   :  { %2862 = vmatmul.mubr.msk.f32.vlgmr.msra.gmra.mrb[10].mxu1 %vm180_vm3, %v1112_v57 }
 0xb3a   :  { %3092 = vmatpush3.bf16.msra.mxu1 %v3507_v5  ;;  %2883 = vmatprep.mubr.msk.f32.mxu1 %vm3390_vm0, %v3391_v1 }
 0xb3b   :  { %v1188_v58 = vpop.permute.xlu1 %1187  ;;  %3093 = vmatprep.subr.bf16.mxu1 %v3389_v0 }
 0xb3c   :  { %2873 = vmatmul.mubr.msk.f32.vlgmr.msra.gmra.mrb[12].mxu0 %vm180_vm3, %v1188_v58 }
 0xb3d   :  { %3098 = vmatpush3.bf16.msra.mxu0 %v3546_v32  ;;  %2894 = vmatprep.mubr.msk.f32.mxu0 %vm3390_vm0, %v3391_v1 }
 0xb3e   :  { %3095 = vmatpush3.bf16.msra.mxu1 %v3522_v10  ;;  %3099 = vmatprep.subr.bf16.mxu0 %v3389_v0 }
 0xb3f   :  { %3102 = vmatprep.subr.bf16.mxu1 %v3389_v0 }
 0xb41   :  { %2884 = vmatmul.mubr.msk.f32.vlgmr.msra.gmra.mrb[12].mxu1 %vm180_vm3, %v1188_v58  ;;  %3101 = vmatpush3.bf16.msra.mxu0 %v3563_v39 }
 0xb42   :  { %3104 = vmatpush3.bf16.msra.mxu1 %v3554_v36  ;;  %3108 = vmatprep.subr.bf16.mxu0 %v3389_v0 }
 0xb43   :  { %3105 = vmatprep.subr.bf16.mxu1 %v3389_v0  ;;  %2905 = vmatprep.mubr.msk.f32.mxu1 %vm3390_vm0, %v3391_v1 }
 0xb46   :  { %3107 = vmatpush3.bf16.msra.mxu1 %v3567_v40 }
 0xb47   :  { %3114 = vmatprep.subr.bf16.mxu1 %v3389_v0 }
 0xc0c   :  { %v1181_v59 = vpop.f32.mrb[10].mxu1 }
 0xc0d   :  { %v2863_v60 = vpop.f32.mrb[11].mxu1 }
 0xc0f   :  { %v1257_v61 = vpop.f32.mrb[12].mxu0 }
 0xc10   :  { %v1258_v62 = vadd.f32 %v1257_v61, %v1181_v59  ;;  %v2874_v63 = vpop.f32.mrb[13].mxu0 }
 0xc12   :  { %v1261_v2 = vadd.f32 %v3600_v47, %v1258_v62 }
 0xc14   :  { %3239 = vtanh.f32 %v1261_v2  ;;  %v1352_v3 = vpop.f32.mrb[12].mxu1  ;;  %v2583_v9 = vmul.f32 -1.442695, %v1261_v2 }
 0xc15   :  { %v1356_v4 = vadd.f32 %v1352_v3, %v3536_v13  ;;  %v2885_v6 = vpop.f32.mrb[13].mxu1 }
 0xc17   :  { %3241 = vtanh.f32 %v1356_v4  ;;  %v2585_v11 = vmul.f32 -1.442695, %v1356_v4 }
 0xc18   :  { %3243 = vpow2.f32 %v2583_v9 }
 0xc19   :  { %3245 = vpow2.f32 %v2585_v11 }
 0xc1e   :  { %v3240_v7 = vpop.eup %3239 }
 0xc1f   :  { %1271 = vrot.lane.b32.xlu0 %v3240_v7, %s3392_s29 }
 0xc21   :  { %v3242_v8 = vpop.eup %3241 }
 0xc22   :  { %1369 = vrot.lane.b32.xlu1 %v3242_v8, %s3392_s29  ;;  %v3244_v12 = vpop.eup %3243 }
 0xc23   :  { %v3246_v14 = vpop.eup %3245  ;;  %v1265_v16 = vadd.f32 1.0, %v3244_v12 }
 0xc24   :  { %v1360_v17 = vadd.f32 1.0, %v3246_v14 }
 0xc25   :  { %3247 = vrcp.f32 %v1265_v16 }
 0xc26   :  { %3249 = vrcp.f32 %v1360_v17 }
 0xc2f   :  { %v3248_v18 = vpop.eup %3247 }
 0xc30   :  { %v3250_v21 = vpop.eup %3249  ;;  %v1269_v24 = vmul.f32 %v3248_v18, %v3687_v48 }
 0xc31   :  { %v1367_v28 = vmul.f32 %v3250_v21, %v1365_v25 }
 0xc91   :  { %v1272_v19 = vpop.permute.xlu0 %1271 }
 0xc92   :  { %v1274_v20 = vmul.f32 %v3248_v18, %v1272_v19 }
 0xc94   :  { %1276 = vrot.lane.b32.xlu0 %v1274_v20, %s3392_s29  ;;  %v1370_v22 = vpop.permute.xlu1 %1369 }
 0xc95   :  { %v1372_v23 = vmul.f32 %v3250_v21, %v1370_v22 }
 0xc97   :  { %1374 = vrot.lane.b32.xlu1 %v1372_v23, %s3392_s29 }
 0xd06   :  { %v1277_v26 = vpop.permute.xlu0 %1276 }
 0xd07   :  { %v3726_v27 = vadd.f32 %v1277_v26, %v1269_v24 }
 0xd09   :  { %3251 = vtanh.f32 %v3726_v27  ;;  %v1375_v29 = vpop.permute.xlu1 %1374 }
 0xd0a   :  { %v3729_v30 = vadd.f32 %v1375_v29, %v1367_v28 }
 0xd0c   :  { %3253 = vtanh.f32 %v3729_v30  ;;  %v1641_v9 = vrot.slane %v3729_v30, 6 }
 0xd13   :  { %v3252_v31 = vpop.eup %3251 }
 0xd14   :  { %1282 = vrot.lane.b32.xlu0 %v3252_v31, %s3392_s29 }
 0xd16   :  { %v3254_v33 = vpop.eup %3253 }
 0xd17   :  { %1380 = vrot.lane.b32.xlu1 %v3254_v33, %s3392_s29 }
 0xd86   :  { %v1283_v34 = vpop.permute.xlu0 %1282 }
 0xd87   :  { %v1285_v15 = vmul.f32 %v3248_v18, %v1283_v34 }
 0xd89   :  { %1385 = vrot.lane.b32.xlu0 %v1285_v15, %s3393_s5  ;;  %v1381_v35 = vpop.permute.xlu1 %1380 }
 0xd8a   :  { %v1383_v37 = vmul.f32 %v3250_v21, %v1381_v35 }
 0xd8c   :  { %1460 = vrot.lane.b32.xlu1 %v1383_v37, %s3393_s5 }
 0xdfb   :  { %v1386_v38 = vpop.permute.xlu0 %1385 }
 0xdfc   :  { %2895 = vmatmul.mubr.msk.f32.vlgmr.msra.gmra.mrb[14].mxu0 %vm180_vm3, %v1386_v38 }
 0xdfd   :  { %3110 = vmatpush3.bf16.msra.mxu0 %v3507_v5  ;;  %2916 = vmatprep.mubr.msk.f32.mxu0 %vm3390_vm0, %v3391_v1 }
 0xdfe   :  { %v1461_v41 = vpop.permute.xlu1 %1460  ;;  %3111 = vmatprep.subr.bf16.mxu0 %v3389_v0 }
 0xdff   :  { %2906 = vmatmul.mubr.msk.f32.vlgmr.msra.gmra.mrb[14].mxu1 %vm180_vm3, %v1461_v41 }
 0xe00   :  { %3116 = vmatpush3.bf16.msra.mxu1 %v3546_v32  ;;  %2927 = vmatprep.mubr.msk.f32.mxu1 %vm3390_vm0, %v3391_v1 }
 0xe01   :  { %3113 = vmatpush3.bf16.msra.mxu0 %v3522_v10  ;;  %3117 = vmatprep.subr.bf16.mxu1 %v3389_v0 }
 0xe02   :  { %3120 = vmatprep.subr.bf16.mxu0 %v3389_v0 }
 0xe04   :  { %2917 = vmatmul.mubr.msk.f32.vlgmr.msra.gmra.mrb[16].mxu0 %vm180_vm3, %v1461_v41  ;;  %3119 = vmatpush3.bf16.msra.mxu1 %v3563_v39 }
 0xe05   :  { %3122 = vmatpush3.bf16.msra.mxu0 %v3554_v36  ;;  %3126 = vmatprep.subr.bf16.mxu1 %v3389_v0 }
 0xe06   :  { %3123 = vmatprep.subr.bf16.mxu0 %v3389_v0  ;;  %2938 = vmatprep.mubr.msk.f32.mxu0 %vm3390_vm0, %v3391_v1 }
 0xe09   :  { %3125 = vmatpush3.bf16.msra.mxu0 %v3567_v40 }
 0xe0a   :  { %3132 = vmatprep.subr.bf16.mxu0 %v3389_v0 }
 0xecf   :  { %v1455_v42 = vpop.f32.mrb[14].mxu0 }
 0xed0   :  { %v2896_v43 = vpop.f32.mrb[15].mxu0 }
 0xed2   :  { %v1530_v44 = vpop.f32.mrb[14].mxu1 }
 0xed3   :  { %v1531_v45 = vadd.f32 %v1530_v44, %v1455_v42  ;;  %v2907_v46 = vpop.f32.mrb[15].mxu1 }
 0xed5   :  { %v1534_v48 = vadd.f32 %v3600_v47, %v1531_v45 }
 0xed7   :  { %3255 = vtanh.f32 %v1534_v48  ;;  %v1625_v49 = vpop.f32.mrb[16].mxu0  ;;  %v2588_v55 = vmul.f32 -1.442695, %v1534_v48 }
 0xed8   :  { %v1630_v50 = vrot.slane %v1625_v49, 6  ;;  %v2918_v51 = vpop.f32.mrb[17].mxu0 }
 0xeda   :  { %v1632_v52 = vadd.f32 %v1630_v50, %v3536_v13 }
 0xedc   :  { %3257 = vtanh.f32 %v1632_v52  ;;  %v2590_v56 = vmul.f32 -1.442695, %v1632_v52 }
 0xedd   :  { %3259 = vpow2.f32 %v2588_v55 }
 0xede   :  { %3261 = vpow2.f32 %v2590_v56 }
 0xee1   :  { %v3256_v53 = vpop.eup %3255 }
 0xee2   :  { %1544 = vrot.lane.b32.xlu0 %v3256_v53, %s3392_s29 }
 0xee6   :  { %v3258_v54 = vpop.eup %3257 }
 0xee7   :  { %1645 = vrot.lane.b32.xlu1 %v3258_v54, %s3392_s29  ;;  %v3260_v57 = vpop.eup %3259 }
 0xee8   :  { %v1538_v58 = vadd.f32 1.0, %v3260_v57  ;;  %v3262_v59 = vpop.eup %3261 }
 0xee9   :  { %v1636_v60 = vadd.f32 1.0, %v3262_v59 }
 0xeea   :  { %3263 = vrcp.f32 %v1538_v58 }
 0xeeb   :  { %3265 = vrcp.f32 %v1636_v60 }
 0xef4   :  { %v3264_v61 = vpop.eup %3263 }
 0xef5   :  { %v3266_v2 = vpop.eup %3265  ;;  %v1542_v6 = vmul.f32 %v3264_v61, %v3726_v27 }
 0xef6   :  { %v1643_v11 = vmul.f32 %v3266_v2, %v1641_v9 }
 0xf54   :  { %v1545_v62 = vpop.permute.xlu0 %1544 }
 0xf55   :  { %v1547_v63 = vmul.f32 %v3264_v61, %v1545_v62 }
 0xf57   :  { %1549 = vrot.lane.b32.xlu0 %v1547_v63, %s3392_s29 }
 0xf59   :  { %v1646_v3 = vpop.permute.xlu1 %1645 }
 0xf5a   :  { %v1648_v4 = vmul.f32 %v3266_v2, %v1646_v3 }
 0xf5c   :  { %1650 = vrot.lane.b32.xlu1 %v1648_v4, %s3392_s29 }
 0xfc9   :  { %v1550_v7 = vpop.permute.xlu0 %1549 }
 0xfca   :  { %v3764_v8 = vadd.f32 %v1550_v7, %v1542_v6 }
 0xfcc   :  { %3267 = vtanh.f32 %v3764_v8 }
 0xfce   :  { %v1651_v12 = vpop.permute.xlu1 %1650 }
 0xfcf   :  { %v3768_v14 = vadd.f32 %v1651_v12, %v1643_v11 }
 0xfd1   :  { %3269 = vtanh.f32 %v3768_v14  ;;  %v1918_v53 = vrot.slane %v3768_v14, 6 }
 0xfd6   :  { %v3268_v16 = vpop.eup %3267 }
 0xfd7   :  { %1555 = vrot.lane.b32.xlu0 %v3268_v16, %s3392_s29 }
 0xfdb   :  { %v3270_v17 = vpop.eup %3269 }
 0xfdc   :  { %1656 = vrot.lane.b32.xlu1 %v3270_v17, %s3392_s29 }
0x1049   :  { %v1556_v18 = vpop.permute.xlu0 %1555 }
0x104a   :  { %v1558_v19 = vmul.f32 %v3264_v61, %v1556_v18 }
0x104c   :  { %1661 = vrot.lane.b32.xlu0 %v1558_v19, %s3393_s5 }
0x104e   :  { %v1657_v20 = vpop.permute.xlu1 %1656 }
0x104f   :  { %v1659_v21 = vmul.f32 %v3266_v2, %v1657_v20 }
0x1051   :  { %v1736_v22 = vrot.slane %v1659_v21, 2 }
0x1053   :  { %1737 = vrot.lane.b32.xlu1 %v1736_v22, %s3393_s5 }
0x10be   :  { %v1662_v23 = vpop.permute.xlu0 %1661 }
0x10bf   :  { %2928 = vmatmul.mubr.msk.f32.vlgmr.msra.gmra.mrb[16].mxu1 %vm180_vm3, %v1662_v23 }
0x10c0   :  { %3128 = vmatpush3.bf16.msra.mxu1 %v3507_v5  ;;  %2949 = vmatprep.mubr.msk.f32.mxu1 %vm3390_vm0, %v3391_v1 }
0x10c1   :  { %3129 = vmatprep.subr.bf16.mxu1 %v3389_v0 }
0x10c4   :  { %3131 = vmatpush3.bf16.msra.mxu1 %v3522_v10 }
0x10c5   :  { %v1738_v24 = vpop.permute.xlu1 %1737  ;;  %3138 = vmatprep.subr.bf16.mxu1 %v3389_v0 }
0x10c6   :  { %2939 = vmatmul.mubr.msk.f32.vlgmr.msra.gmra.mrb[18].mxu0 %vm180_vm3, %v1738_v24 }
0x10c7   :  { %2950 = vmatmul.mubr.msk.f32.vlgmr.msra.gmra.mrb[18].mxu1 %vm180_vm3, %v1738_v24  ;;  %3134 = vmatpush3.bf16.msra.mxu0 %v3546_v32 }
0x10c8   :  { %3135 = vmatprep.subr.bf16.mxu0 %v3389_v0  ;;  %3140 = vmatpush3.bf16.msra.mxu1 %v3554_v36 }
0x10c9   :  { %2960 = vmatprep.mubr.msk.f32.mxu0 %vm3390_vm0, %v3391_v1  ;;  %3141 = vmatprep.subr.bf16.mxu1 %v3389_v0 }
0x10ca   :  { %2971 = vmatprep.mubr.msk.f32.mxu1 %vm3390_vm0, %v3391_v1 }
0x10cb   :  { %3137 = vmatpush3.bf16.msra.mxu0 %v3563_v39 }
0x10cc   :  { %3144 = vmatprep.subr.bf16.mxu0 %v3389_v0  ;;  %3143 = vmatpush3.bf16.msra.mxu1 %v3567_v40 }
0x10cd   :  { %3150 = vmatprep.subr.bf16.mxu1 %v3389_v0 }
0x1192   :  { %v1731_v25 = vpop.f32.mrb[16].mxu1 }
0x1193   :  { %v2929_v26 = vpop.f32.mrb[17].mxu1 }
0x1199   :  { %v1807_v27 = vpop.f32.mrb[18].mxu0 }
0x119a   :  { %v1808_v28 = vadd.f32 %v1807_v27, %v1731_v25  ;;  %v2940_v29 = vpop.f32.mrb[19].mxu0  ;;  %v1902_v30 = vpop.f32.mrb[18].mxu1 }
0x119b   :  { %v1907_v31 = vrot.slane %v1902_v30, 4  ;;  %v2951_v33 = vpop.f32.mrb[19].mxu1 }
0x119c   :  { %v1811_v34 = vadd.f32 %v3600_v47, %v1808_v28 }
0x119d   :  { %v1909_v15 = vadd.f32 %v1907_v31, %v3536_v13 }
0x119e   :  { %3271 = vtanh.f32 %v1811_v34  ;;  %v2593_v38 = vmul.f32 -1.442695, %v1811_v34 }
0x119f   :  { %3273 = vtanh.f32 %v1909_v15  ;;  %v2595_v41 = vmul.f32 -1.442695, %v1909_v15 }
0x11a0   :  { %3275 = vpow2.f32 %v2593_v38 }
0x11a1   :  { %3277 = vpow2.f32 %v2595_v41 }
0x11a8   :  { %v3272_v35 = vpop.eup %3271 }
0x11a9   :  { %v3274_v37 = vpop.eup %3273  ;;  %1821 = vrot.lane.b32.xlu0 %v3272_v35, %s3392_s29 }
0x11aa   :  { %1922 = vrot.lane.b32.xlu1 %v3274_v37, %s3392_s29  ;;  %v3276_v42 = vpop.eup %3275 }
0x11ab   :  { %v3278_v43 = vpop.eup %3277  ;;  %v1815_v44 = vadd.f32 1.0, %v3276_v42 }
0x11ac   :  { %v1913_v45 = vadd.f32 1.0, %v3278_v43 }
0x11ad   :  { %3279 = vrcp.f32 %v1815_v44 }
0x11ae   :  { %3281 = vrcp.f32 %v1913_v45 }
0x11b7   :  { %v3280_v46 = vpop.eup %3279 }
0x11b8   :  { %v3282_v49 = vpop.eup %3281  ;;  %v1819_v54 = vmul.f32 %v3280_v46, %v3764_v8 }
0x11b9   :  { %v1920_v56 = vmul.f32 %v3282_v49, %v1918_v53 }
0x121b   :  { %v1822_v48 = vpop.permute.xlu0 %1821 }
0x121c   :  { %v1824_v50 = vmul.f32 %v3280_v46, %v1822_v48  ;;  %v1923_v51 = vpop.permute.xlu1 %1922 }
0x121d   :  { %v1925_v52 = vmul.f32 %v3282_v49, %v1923_v51 }
0x121e   :  { %1826 = vrot.lane.b32.xlu0 %v1824_v50, %s3392_s29 }
0x121f   :  { %1927 = vrot.lane.b32.xlu1 %v1925_v52, %s3392_s29 }
0x1290   :  { %v1827_v55 = vpop.permute.xlu0 %1826 }
0x1291   :  { %v3804_v57 = vadd.f32 %v1827_v55, %v1819_v54  ;;  %v1928_v58 = vpop.permute.xlu1 %1927 }
0x1292   :  { %v3806_v59 = vadd.f32 %v1928_v58, %v1920_v56 }
0x1293   :  { %3283 = vtanh.f32 %v3804_v57 }
0x1294   :  { %3285 = vtanh.f32 %v3806_v59  ;;  %v2195_v31 = vrot.slane %v3806_v59, 6 }
0x129d   :  { %v3284_v60 = vpop.eup %3283 }
0x129e   :  { %v3286_v61 = vpop.eup %3285  ;;  %1832 = vrot.lane.b32.xlu0 %v3284_v60, %s3392_s29 }
0x129f   :  { %1933 = vrot.lane.b32.xlu1 %v3286_v61, %s3392_s29 }
0x1310   :  { %v1833_v62 = vpop.permute.xlu0 %1832 }
0x1311   :  { %v1835_v63 = vmul.f32 %v3280_v46, %v1833_v62  ;;  %v1934_v2 = vpop.permute.xlu1 %1933 }
0x1312   :  { %v1936_v3 = vmul.f32 %v3282_v49, %v1934_v2 }
0x1313   :  { %1938 = vrot.lane.b32.xlu0 %v1835_v63, %s3393_s5 }
0x1314   :  { %v2013_v4 = vrot.slane %v1936_v3, 4 }
0x1316   :  { %2014 = vrot.lane.b32.xlu1 %v2013_v4, %s3393_s5 }
0x1385   :  { %v1939_v6 = vpop.permute.xlu0 %1938 }
0x1386   :  { %2961 = vmatmul.mubr.msk.f32.vlgmr.msra.gmra.mrb[20].mxu0 %vm180_vm3, %v1939_v6  ;;  %v2604_v6 = vld [vmem:[%s3911_s8] ss:$0 sm:$0xff] }
0x1387   :  { %3146 = vmatpush3.bf16.msra.mxu0 %v3507_v5  ;;  %2982 = vmatprep.mubr.msk.f32.mxu0 %vm3390_vm0, %v3391_v1 }
0x1388   :  { %v2015_v7 = vpop.permute.xlu1 %2014  ;;  %3147 = vmatprep.subr.bf16.mxu0 %v3389_v0 }
0x1389   :  { %2972 = vmatmul.mubr.msk.f32.vlgmr.msra.gmra.mrb[20].mxu1 %vm180_vm3, %v2015_v7 }
0x138a   :  { %3152 = vmatpush3.bf16.msra.mxu1 %v3546_v32  ;;  %2993 = vmatprep.mubr.msk.f32.mxu1 %vm3390_vm0, %v3391_v1 }
0x138b   :  { %3149 = vmatpush3.bf16.msra.mxu0 %v3522_v10  ;;  %3153 = vmatprep.subr.bf16.mxu1 %v3389_v0 }
0x138c   :  { %3156 = vmatprep.subr.bf16.mxu0 %v3389_v0 }
0x138e   :  { %2983 = vmatmul.mubr.msk.f32.vlgmr.msra.gmra.mrb[22].mxu0 %vm180_vm3, %v2015_v7  ;;  %3155 = vmatpush3.bf16.msra.mxu1 %v3563_v39 }
0x138f   :  { %3158 = vmatpush3.bf16.msra.mxu0 %v3554_v36  ;;  %3004 = vmatprep.mubr.msk.f32.mxu0 %vm3390_vm0, %v3391_v1 }
0x1390   :  { %3159 = vmatprep.subr.bf16.mxu0 %v3389_v0  ;;  %3162 = vmatprep.subr.bf16.mxu1 %v3389_v0 }
0x1393   :  { %3161 = vmatpush3.bf16.msra.mxu0 %v3567_v40 }
0x1459   :  { %v2008_v5 = vpop.f32.mrb[20].mxu0 }
0x145a   :  { %v2962_v10 = vpop.f32.mrb[21].mxu0 }
0x145c   :  { %v2084_v32 = vpop.f32.mrb[20].mxu1 }
0x145d   :  { %v2085_v8 = vadd.f32 %v2084_v32, %v2008_v5  ;;  %v2973_v9 = vpop.f32.mrb[21].mxu1 }
0x145f   :  { %v2088_v11 = vadd.f32 %v3600_v47, %v2085_v8 }
0x1461   :  { %3287 = vtanh.f32 %v2088_v11  ;;  %v2179_v39 = vpop.f32.mrb[22].mxu0  ;;  %v2598_v40 = vmul.f32 -1.442695, %v2088_v11  ;;  %v2605_v11 = vld [vmem:[%s3912_s9] ss:$0 sm:$0xff] }
0x1462   :  { %v2184_v12 = vrot.slane %v2179_v39, 2  ;;  %v2984_v36 = vpop.f32.mrb[23].mxu0  ;;  %v2433_v39 = vld [vmem:[%s3913_s10] sm:$0xff] }
0x1463   :  { %v2435_v36 = vld [vmem:[%s3913_s10 + $0x10] sm:$0xff] }
0x1464   :  { %v2186_v14 = vadd.f32 %v2184_v12, %v3536_v13  ;;  %v2434_v12 = vld [vmem:[%s3913_s10 + $0x8] sm:$0xff] }
0x1466   :  { %3289 = vtanh.f32 %v2186_v14  ;;  %v2600_v18 = vmul.f32 -1.442695, %v2186_v14  ;;  %v3163_v14 = vpack.c.bf16 %v2434_v12, %v2433_v39 }
0x1467   :  { %3291 = vpow2.f32 %v2598_v40 }
0x1468   :  { %3293 = vpow2.f32 %v2600_v18 }
0x146b   :  { %v3288_v16 = vpop.eup %3287 }
0x146c   :  { %2098 = vrot.lane.b32.xlu1 %v3288_v16, %s3392_s29  ;;  %v2436_v16 = vld [vmem:[%s3913_s10 + $0x18] sm:$0xff] }
0x1470   :  { %v3290_v17 = vpop.eup %3289 }
0x1471   :  { %2199 = vrot.lane.b32.xlu0 %v3290_v17, %s3392_s29  ;;  %v3292_v19 = vpop.eup %3291  ;;  %v3166_v17 = vpack.c.bf16 %v2436_v16, %v2435_v36 }
0x1472   :  { %v2092_v20 = vadd.f32 1.0, %v3292_v19  ;;  %v3294_v21 = vpop.eup %3293 }
0x1473   :  { %v2190_v22 = vadd.f32 1.0, %v3294_v21  ;;  %v2437_v21 = vld [vmem:[%s3904_s1] sm:$0x3] }
0x1474   :  { %3295 = vrcp.f32 %v2092_v20  ;;  %v3394_v20 = vmov 0  }
0x1475   :  { %3297 = vrcp.f32 %v2190_v22  ;;  %3180 = vset.pattern.permute.xlu0 %v3394_v20  ;;  %v3395_v22 = vmov 1  }
0x1476   :  { %3181 = vset.pattern.permute.xlu1 %v3395_v22 }
0x147e   :  { %v3296_v23 = vpop.eup %3295 }
0x147f   :  { %v3298_v25 = vpop.eup %3297  ;;  %v2096_v28 = vmul.f32 %v3296_v23, %v3804_v57 }
0x1480   :  { %v2197_v33 = vmul.f32 %v3298_v25, %v2195_v31 }
0x14de   :  { %v2099_v24 = vpop.permute.xlu1 %2098 }
0x14df   :  { %v2101_v13 = vmul.f32 %v3296_v23, %v2099_v24 }
0x14e1   :  { %2103 = vrot.lane.b32.xlu1 %v2101_v13, %s3392_s29 }
0x14e3   :  { %v2200_v26 = vpop.permute.xlu0 %2199 }
0x14e4   :  { %v2202_v27 = vmul.f32 %v3298_v25, %v2200_v26 }
0x14e6   :  { %2204 = vrot.lane.b32.xlu0 %v2202_v27, %s3392_s29 }
0x1553   :  { %v2104_v29 = vpop.permute.xlu1 %2103 }
0x1554   :  { %v2106_v30 = vadd.f32 %v2104_v29, %v2096_v28  ;;  %v2606_v28 = vld [vmem:[%s3914_s11] ss:$0 sm:$0xff] }
0x1556   :  { %3299 = vtanh.f32 %v2106_v30 }
0x1558   :  { %v2205_v34 = vpop.permute.xlu0 %2204 }
0x1559   :  { %v2207_v15 = vadd.f32 %v2205_v34, %v2197_v33 }
0x155b   :  { %3301 = vtanh.f32 %v2207_v15 }
0x1560   :  { %v3300_v35 = vpop.eup %3299 }
0x1561   :  { %2109 = vrot.lane.b32.xlu1 %v3300_v35, %s3392_s29 }
0x1565   :  { %v3302_v37 = vpop.eup %3301 }
0x1566   :  { %2210 = vrot.lane.b32.xlu0 %v3302_v37, %s3392_s29 }
0x15d3   :  { %v2110_v38 = vpop.permute.xlu1 %2109 }
0x15d4   :  { %v2112_v41 = vmul.f32 %v3296_v23, %v2110_v38  ;;  %v2609_v38 = vld [vmem:[%s3915_s12] ss:$0 sm:$0xff] }
0x15d6   :  { %2215 = vrot.lane.b32.xlu0 %v2112_v41, %s3393_s5 }
0x15d8   :  { %v2211_v42 = vpop.permute.xlu0 %2210 }
0x15d9   :  { %v2213_v43 = vmul.f32 %v3298_v25, %v2211_v42 }
0x15db   :  { %v2290_v44 = vrot.slane %v2213_v43, 6 }
0x15dd   :  { %2291 = vrot.lane.b32.xlu1 %v2290_v44, %s3393_s5 }
0x1648   :  { %v2216_v45 = vpop.permute.xlu0 %2215 }
0x1649   :  { %2994 = vmatmul.mubr.msk.f32.vlgmr.msra.gmra.mrb[22].mxu1 %vm180_vm3, %v2216_v45 }
0x164a   :  { %3015 = vmatprep.mubr.msk.f32.mxu1 %vm3390_vm0, %v3391_v1  ;;  %3164 = vmatpush3.bf16.msra.mxu1 %v3163_v14 }
0x164b   :  { %3165 = vmatprep.subr.bf16.mxu1 %v3389_v0 }
0x164e   :  { %3167 = vmatpush3.bf16.msra.mxu1 %v3166_v17 }
0x164f   :  { %v2292_v46 = vpop.permute.xlu1 %2291 }
0x1650   :  { %3005 = vmatmul.mubr.msk.f32.vlgmr.msra.gmra.mrb[24].mxu0 %vm180_vm3, %v2292_v46 }
0x171c   :  { %v2285_v48 = vpop.f32.mrb[22].mxu1 }
0x171d   :  { %v2995_v49 = vpop.f32.mrb[23].mxu1 }
0x1723   :  { %v2361_v50 = vpop.f32.mrb[24].mxu0 }
0x1724   :  { %v2362_v51 = vadd.f32 %v2361_v50, %v2285_v48  ;;  %v3006_v52 = vpop.f32.mrb[25].mxu0 }
0x1726   :  { %v2365_v53 = vadd.f32 %v3600_v47, %v2362_v51 }
0x1728   :  { %3303 = vtanh.f32 %v2365_v53  ;;  %v2603_v55 = vmul.f32 -1.442695, %v2365_v53 }
0x172a   :  { %3305 = vpow2.f32 %v2603_v55 }
0x1732   :  { %v3304_v54 = vpop.eup %3303 }
0x1733   :  { %2375 = vrot.lane.b32.xlu0 %v3304_v54, %s3392_s29 }
0x1734   :  { %v3306_v56 = vpop.eup %3305 }
0x1735   :  { %v2369_v57 = vadd.f32 1.0, %v3306_v56 }
0x1737   :  { %3307 = vrcp.f32 %v2369_v57 }
0x1741   :  { %v3308_v1 = vpop.eup %3307 }
0x1742   :  { %v2373_v60 = vmul.f32 %v3308_v1, %v2106_v30  ;;  %v2608_v30 = vld [vmem:[%s3914_s11 + $0x1] ss:$0 sm:$0xff] }
0x17a5   :  { %v2376_v58 = vpop.permute.xlu0 %2375 }
0x17a6   :  { %v2378_v59 = vmul.f32 %v3308_v1, %v2376_v58 }
0x17a8   :  { %2380 = vrot.lane.b32.xlu1 %v2378_v59, %s3392_s29 }
0x181a   :  { %v2381_v61 = vpop.permute.xlu1 %2380 }
0x181b   :  { %v2383_v62 = vadd.f32 %v2381_v61, %v2373_v60 }
0x181d   :  { %3309 = vtanh.f32 %v2383_v62 }
0x1827   :  { %v3310_v63 = vpop.eup %3309 }
0x1828   :  { %2386 = vrot.lane.b32.xlu0 %v3310_v63, %s3392_s29 }
0x189a   :  { %v2387_v47 = vpop.permute.xlu0 %2386 }
0x189b   :  { %v2389_v2 = vmul.f32 %v3308_v1, %v2387_v47 }
0x189d   :  { %2391 = vrot.lane.b32.xlu1 %v2389_v2, %s3393_s5 }
0x190f   :  { %v2392_v3 = vpop.permute.xlu1 %2391 }
0x1910   :  { %v2395_v4 = vsel %vm2394_vm4, %v2392_v3, 0.0 }
0x1911   :  { %2396 = vadd.xlane.f32.xlu0 %v2395_v4 }
0x1927   :  { %2419 = vrot.lane.b32.xlu0 %v2604_v6, %s3393_s5 }
0x199e   :  { %v2397_v7 = vpop.xlane.xlu0 %2396 }
0x199f   :  { %v2399_v5 = vmul.f32 0.03125, %v2397_v7 }
0x19a1   :  { %v2400_v10 = vsub.f32 %v2389_v2, %v2399_v5 }
0x19a2   :  { %v2420_v24 = vpop.permute.xlu0 %2419 }
0x19a3   :  { %v2401_v32 = vmul.f32 %v2400_v10, %v2400_v10 }
0x19a5   :  { %2403 = vrot.lane.b32.xlu1 %v2401_v32, %s3393_s5 }
0x1a17   :  { %v2404_v8 = vpop.permute.xlu1 %2403 }
0x1a18   :  { %v2406_v9 = vsel %vm2394_vm4, %v2404_v8, 0.0 }
0x1a19   :  { %2407 = vadd.xlane.f32.xlu1 %v2406_v9 }
0x1a2a   :  { %2429 = vrot.lane.b32.xlu1 %v2605_v11, %s3393_s5 }
0x1a2e   :  { %2526 = vperm.xlu1 %3181, %v2437_v21  }
0x1aa6   :  { %v2408_v40 = vpop.xlane.xlu1 %2407 }
0x1aa7   :  { %v2409_v18 = vmul.f32 0.03125, %v2408_v40 }
0x1aa9   :  { %v2410_v19 = vadd.f32 1e-05, %v2409_v18 }
0x1aaa   :  { %v2430_v25 = vpop.permute.xlu1 %2429 }
0x1aab   :  { %3311 = vrsqrt.f32 %v2410_v19 }
0x1aae   :  { %v2527_v31 = vpop.permute.xlu1 %2526 }
0x1aaf   :  { %v2533_v34 = vmul.f32 %v2608_v30, %v2527_v31 }
0x1ab5   :  { %v3312_v23 = vpop.eup %3311 }
0x1ab6   :  { %v2412_v13 = vmul.f32 %v3312_v23, %v2400_v10 }
0x1ab8   :  { %v2422_v26 = vmul.f32 %v2420_v24, %v2412_v13 }
0x1aba   :  { %v2432_v0 = vadd.f32 %v2430_v25, %v2422_v26 }
0x1abc   :  { %2450 = vrot.lane.b32.xlu0 %v2432_v0, %s3393_s5 }
0x1ac0   :  { %2441 = vperm.xlu0 %3180, %v2437_v21  }
0x1ac4   :  { %3182 = vset.pattern.permute.xlu0 %v3395_v22 }
0x1b2e   :  { %v2451_v27 = vpop.permute.xlu0 %2450 }
0x1b2f   :  { %3016 = vmatmul.mubr.msk.f32.vlgmr.msra.gmra.mrb[24].mxu1 %vm180_vm3, %v2451_v27 }
0x1b3f   :  { %v2442_v29 = vpop.permute.xlu0 %2441 }
0x1b40   :  { %v2448_v33 = vmul.f32 %v2606_v28, %v2442_v29 }
0x1c02   :  { %v2520_v15 = vpop.f32.mrb[24].mxu1 }
0x1c03   :  { %v2521_v35 = vadd.f32 %v2520_v15, %v2448_v33  ;;  %v3017_v37 = vpop.f32.mrb[25].mxu1 }
0x1c05   :  { %v2534_v41 = vadd.f32 %v2533_v34, %v2521_v35 }
0x1c07   :  { %v2542_v42 = vadd.f32 %v2609_v38, %v2534_v41 }
0x1c09   :  { %2544 = vst.msk [vmem:[#allocation7] sm:$0x3] %vm2543_vm5, %v2542_v42 }
0x1c0a   :  { %3368 = shalt.err (!%p3365_p6)
}
0x1c0b   :  { %s3369_s17 = scalar_lea.hbm %s3916_s13, 32 }
0x1c0c   :  { %p3370_p7 = scmp.ne.s32.totalorder %s3916_s13, %s3369_s17  ;;  %p3373_p8 = scmp.lt.u32.totalorder %s3369_s17, %s3916_s13 }
0x1c0e   :  { %p3375_p9 = pnand %p3373_p8, %p3370_p7 }
0x1c10   :  { %3378 = shalt.err (!%p3375_p9)
}
0x1c11   :  { %2554 = dma.vmem_to_hbm [thread:$0]  %s2552_s26, 32, %s3916_s13, [#allocation4]  }
0x1c12   :  { %3383 = dma.done.wait [#allocation4], 32  }
0x1c13   :  { %3384 = vsyncadd [#allocation4], 4294967264 }
0x1c14   :  { %2558 = vsyncpa [#allocation3], 1 }
0x1c15   :  { %2559 = vsyncpa [#allocation6], 1 }
0x1c16   :  { %2560 = vsyncpa [#allocation4], 1 }

</bundles_post_ra>
